<compile_context>
chip_gen: v7x
topology: tpu7x:2x2x1
jax: 0.10.0
libtpu: 0.0.40
codegen_flags: <defaults>
</compile_context>

<pallas_src>
import functools

import jax
import jax.numpy as jnp
from jax.experimental import pallas as pl
from jax.experimental.pallas import tpu as pltpu

BN_EPS = 1e-5
VMEM_LIMIT = 48 * 1024 * 1024  # leave headroom on v7x (64 MiB physical VMEM/TC)


# ----------------------------- Pallas kernel --------------------------------

def _fused_matmul_kernel(*refs, act, k_steps, has_residual):
    """Tiled matmul with BN scale/bias + optional residual + activation epilogue.

    refs = (x, w, scale, bias, [residual], out, acc_scratch)
      x:     (tm, tk)  bf16
      w:     (tk, N)   bf16
      scale: (1, N)    f32   (folded BatchNorm scale)
      bias:  (1, N)    f32   (folded BatchNorm bias)
      res:   (tm, N)   f32   (optional residual, added before activation)
      out:   (tm, N)   f32
      acc:   (tm, N)   f32   VMEM accumulator, lives across the K grid axis
    """
    if has_residual:
        x_ref, w_ref, s_ref, b_ref, r_ref, o_ref, acc_ref = refs
    else:
        x_ref, w_ref, s_ref, b_ref, o_ref, acc_ref = refs
        r_ref = None

    k = pl.program_id(1)

    @pl.when(k == 0)
    def _init():
        acc_ref[...] = jnp.zeros_like(acc_ref)

    acc_ref[...] += jnp.dot(x_ref[...], w_ref[...],
                            preferred_element_type=jnp.float32)

    @pl.when(k == k_steps - 1)
    def _finalize():
        y = acc_ref[...] * s_ref[...] + b_ref[...]
        if r_ref is not None:
            y = y + r_ref[...]
        if act == "relu":
            y = jnp.maximum(y, 0.0)
        o_ref[...] = y.astype(o_ref.dtype)


def _pick_tile(dim, candidates, quantum):
    """Largest candidate that exactly divides `dim` (candidates are multiples
    of `quantum`); fall back to the full dimension (always legal)."""
    del quantum
    for c in candidates:
        if c <= dim and dim % c == 0:
            return c
    return dim


def matmul_fused(x, w, scale=None, bias=None, act="none", residual=None):
    """out = act((x @ w) * scale + bias [+ residual]).

    x: (M, K) f32, w: (K, N) f32.  scale/bias broadcast over rows.
    MXU inputs are cast to bf16; accumulation and epilogue stay in f32.
    """
    M, K = x.shape
    K2, N = w.shape
    assert K == K2

    if scale is None:
        scale = jnp.ones((N,), jnp.float32)
    if bias is None:
        bias = jnp.zeros((N,), jnp.float32)

    # Tile choices: M tiles of 256 preferred (feeds v6e/v7x 256-wide MXU, keeps
    # VMEM modest); K tiled only when it is a multiple of 128 (lane quantum),
    # otherwise the full K is one block.
    tm = _pick_tile(M, (256, 512, 128, 64, 32, 16, 8), 8)
    tk = _pick_tile(K, (512, 1024, 256, 128), 128)
    if tk % 128 != 0:
        tk = K  # non-128-multiple K: keep as a single (full-extent) block
    gm, gk = M // tm, K // tk

    x_bf = x.astype(jnp.bfloat16)
    w_bf = w.astype(jnp.bfloat16)
    s2 = scale.reshape(1, N).astype(jnp.float32)
    b2 = bias.reshape(1, N).astype(jnp.float32)

    in_specs = [
        pl.BlockSpec((tm, tk), lambda i, k: (i, k)),   # activations
        pl.BlockSpec((tk, N), lambda i, k: (k, 0)),    # weights
        pl.BlockSpec((1, N), lambda i, k: (0, 0)),     # BN scale
        pl.BlockSpec((1, N), lambda i, k: (0, 0)),     # BN bias
    ]
    args = [x_bf, w_bf, s2, b2]
    has_res = residual is not None
    if has_res:
        in_specs.append(pl.BlockSpec((tm, N), lambda i, k: (i, 0)))
        args.append(residual.astype(jnp.float32))

    bytes_accessed = (M * K * 2 + K * N * 2 + M * N * 4
                      + (M * N * 4 if has_res else 0) + 2 * N * 4)
    cost = pl.CostEstimate(flops=2 * M * K * N, transcendentals=0,
                           bytes_accessed=bytes_accessed)

    kernel = functools.partial(_fused_matmul_kernel, act=act, k_steps=gk,
                               has_residual=has_res)
    return pl.pallas_call(
        kernel,
        out_shape=jax.ShapeDtypeStruct((M, N), jnp.float32),
        grid_spec=pltpu.PrefetchScalarGridSpec(
            num_scalar_prefetch=0,
            grid=(gm, gk),                       # reduction axis last
            in_specs=in_specs,
            out_specs=pl.BlockSpec((tm, N), lambda i, k: (i, 0)),
            scratch_shapes=[pltpu.VMEM((tm, N), jnp.float32)],
        ),
        compiler_params=pltpu.CompilerParams(
            dimension_semantics=("parallel", "arbitrary"),
            vmem_limit_bytes=VMEM_LIMIT),
        cost_estimate=cost,
    )(*args)


# ------------------------------- conv helpers --------------------------------

def bn_fold(bn, eps=BN_EPS):
    gamma, beta, mean, var = bn
    s = gamma * jax.lax.rsqrt(var + eps)
    b = beta - mean * s
    return s, b


def conv2d(x, w, *, stride=1, padding=0, scale=None, bias=None, act="none",
           residual=None):
    """NHWC conv as a single fused Pallas matmul (im2col done in glue)."""
    B, H, W, Cin = x.shape
    Cout, _, kh, kw = w.shape
    Ho = (H + 2 * padding - kh) // stride + 1
    Wo = (W + 2 * padding - kw) // stride + 1
    if kh == 1 and kw == 1 and padding == 0:
        cols = x[:, ::stride, ::stride, :].reshape(B * Ho * Wo, Cin)
    else:
        # TODO(synk): tap-indexed (in-kernel) conv to avoid the kh*kw im2col
        # expansion through HBM; the tiled K axis at least keeps only one
        # K-slab resident in VMEM at a time.
        xp = jnp.pad(x, ((0, 0), (padding, padding), (padding, padding), (0, 0)))
        patches = []
        for di in range(kh):
            for dj in range(kw):
                patches.append(
                    xp[:, di:di + (Ho - 1) * stride + 1:stride,
                       dj:dj + (Wo - 1) * stride + 1:stride, :])
        cols = jnp.concatenate(patches, axis=-1).reshape(B * Ho * Wo,
                                                         kh * kw * Cin)
    wmat = jnp.transpose(w, (2, 3, 1, 0)).reshape(kh * kw * Cin, Cout)
    res2d = None if residual is None else residual.reshape(B * Ho * Wo, Cout)
    out = matmul_fused(cols, wmat, scale=scale, bias=bias, act=act,
                       residual=res2d)
    return out.reshape(B, Ho, Wo, Cout)


def conv_bn_act(x, w, bn, *, stride, padding, act, residual=None):
    s, b = bn_fold(bn)
    return conv2d(x, w, stride=stride, padding=padding, scale=s, bias=b,
                  act=act, residual=residual)


# --------------------------- ComplexBlock forward -----------------------------

def complex_block_forward(params, x_nchw, stride):
    """ComplexBlock (bottleneck, expansion=4), eval-mode BatchNorm.

    x_nchw: (B, Cin, H, W)  ->  (B, 4*out_channels, H/stride, W/stride)
    """
    x = jnp.transpose(x_nchw, (0, 2, 3, 1)).astype(jnp.float32)   # NCHW -> NHWC

    # identity = shortcut(x): 1x1 conv (stride) + BN, or passthrough
    if "short_w" in params:
        ss, sb = bn_fold(params["short_bn"])
        identity = conv2d(x, params["short_w"], stride=stride, padding=0,
                          scale=ss, bias=sb, act="none")
    else:
        identity = x

    # conv1 (1x1) + bn1 + relu
    out = conv_bn_act(x, params["w1"], params["bn1"],
                      stride=1, padding=0, act="relu")
    # conv2 (3x3, stride) + bn2 + relu
    out = conv_bn_act(out, params["w2"], params["bn2"],
                      stride=stride, padding=1, act="relu")
    # conv3 (1x1) + bn3 + residual add + relu  -- all fused in one kernel
    out = conv_bn_act(out, params["w3"], params["bn3"],
                      stride=1, padding=0, act="relu", residual=identity)

    return jnp.transpose(out, (0, 3, 1, 2))                        # NHWC -> NCHW


# ------------------------------ parameter init --------------------------------

def init_complex_block_params(key, in_channels, out_channels, stride):
    expansion = 4

    def conv_w(k, cout, cin, ksz):
        std = (2.0 / (cin * ksz * ksz)) ** 0.5
        return std * jax.random.normal(k, (cout, cin, ksz, ksz), jnp.float32)

    def bn(c):
        # (gamma=1, beta=0, running_mean=0, running_var=1)
        return (jnp.ones((c,), jnp.float32), jnp.zeros((c,), jnp.float32),
                jnp.zeros((c,), jnp.float32), jnp.ones((c,), jnp.float32))

    k1, k2, k3, k4 = jax.random.split(key, 4)
    cout = out_channels * expansion
    p = {
        "w1": conv_w(k1, out_channels, in_channels, 1), "bn1": bn(out_channels),
        "w2": conv_w(k2, out_channels, out_channels, 3), "bn2": bn(out_channels),
        "w3": conv_w(k3, cout, out_channels, 1), "bn3": bn(cout),
    }
    if stride != 1 or in_channels != cout:
        p["short_w"] = conv_w(k4, cout, in_channels, 1)
        p["short_bn"] = bn(cout)
    return p


# ----------------------------------- main --------------------------------------

if __name__ == "__main__":
    B, CIN, H, W = 2, 32, 16, 16
    OUT_CH, STRIDE = 16, 2            # -> output channels = 4 * 16 = 64

    key = jax.random.PRNGKey(0)
    kx, kp = jax.random.split(key)
    x = jax.random.normal(kx, (B, CIN, H, W), jnp.float32)   # NCHW like PyTorch
    params = init_complex_block_params(kp, CIN, OUT_CH, STRIDE)

    fwd = jax.jit(functools.partial(complex_block_forward, stride=STRIDE))
    out = fwd(params, x)
    out = jax.block_until_ready(out)

    assert out.shape == (B, OUT_CH * 4, H // STRIDE, W // STRIDE), out.shape
    assert bool(jnp.all(jnp.isfinite(out)))
    assert bool(jnp.all(out >= 0.0))   # block ends in ReLU
    print("KERNEL_OK")
</pallas_src>

<mosaic_0001>
module attributes {stable_mosaic.version = 11 : i64} {
  func.func @_fused_matmul_kernel(%arg0: i32, %arg1: i32, %arg2: memref<256x32xbf16, #tpu.memory_space<vmem>>, %arg3: memref<32x16xbf16, #tpu.memory_space<vmem>>, %arg4: memref<1x16xf32, #tpu.memory_space<vmem>>, %arg5: memref<1x16xf32, #tpu.memory_space<vmem>>, %arg6: memref<256x16xf32, #tpu.memory_space<vmem>>, %arg7: memref<256x16xf32, #tpu.memory_space<vmem>>) attributes {dimension_semantics = [#tpu.dimension_semantics<parallel>, #tpu.dimension_semantics<arbitrary>], iteration_bounds = array<i64: 2, 1>, scalar_prefetch = 0 : i64, scratch_operands = 1 : i64, tpu.core_type = #tpu.core_type<tc>, window_params = [{transform_indices = @transform_0, window_bounds = array<i64: 256, 32>}, {transform_indices = @transform_1, window_bounds = array<i64: 32, 16>}, {pipeline_mode = #tpu.pipeline_mode<synchronous>, transform_indices = @transform_2, window_bounds = array<i64: 1, 16>}, {pipeline_mode = #tpu.pipeline_mode<synchronous>, transform_indices = @transform_3, window_bounds = array<i64: 1, 16>}, {transform_indices = @transform_4, window_bounds = array<i64: 256, 16>}]} {
    %c0_i32 = arith.constant 0 : i32
    %0 = arith.cmpi eq, %arg1, %c0_i32 : i32
    %1 = arith.extui %0 : i1 to i32
    %c0_i32_0 = arith.constant 0 : i32
    %2 = arith.cmpi ne, %1, %c0_i32_0 : i32
    scf.if %2 {
      %cst_10 = arith.constant 0.000000e+00 : f32
      %12 = vector.broadcast %cst_10 : f32 to vector<256x16xf32>
      %c0_11 = arith.constant 0 : index
      %c0_12 = arith.constant 0 : index
      %13 = vector.load %arg7[%c0_11, %c0_12] : memref<256x16xf32, #tpu.memory_space<vmem>>, vector<256x16xf32>
      tpu.vector_store %arg7[%c0_11, %c0_12], %12 {strides = array<i32>} : memref<256x16xf32, #tpu.memory_space<vmem>>, vector<256x16xf32>,
    } else {
    }
    %c0 = arith.constant 0 : index
    %c0_1 = arith.constant 0 : index
    %3 = vector.load %arg7[%c0, %c0_1] : memref<256x16xf32, #tpu.memory_space<vmem>>, vector<256x16xf32>
    %c0_2 = arith.constant 0 : index
    %c0_3 = arith.constant 0 : index
    %4 = vector.load %arg2[%c0_2, %c0_3] : memref<256x32xbf16, #tpu.memory_space<vmem>>, vector<256x32xbf16>
    %c0_4 = arith.constant 0 : index
    %c0_5 = arith.constant 0 : index
    %5 = vector.load %arg3[%c0_4, %c0_5] : memref<32x16xbf16, #tpu.memory_space<vmem>>, vector<32x16xbf16>
    %cst = arith.constant dense<0.000000e+00> : vector<256x16xf32>
    %6 = tpu.matmul %4, %5, %cst {dimension_numbers = #tpu.dot_dimension_numbers<[1], [0], [0], [1], [0, 0, 1, 1], [], []>} : vector<256x32xbf16>, vector<32x16xbf16>, vector<256x16xf32> -> vector<256x16xf32>
    %7 = arith.addf %3, %6 : vector<256x16xf32>
    %c0_6 = arith.constant 0 : index
    %c0_7 = arith.constant 0 : index
    %8 = vector.load %arg7[%c0_6, %c0_7] : memref<256x16xf32, #tpu.memory_space<vmem>>, vector<256x16xf32>
    tpu.vector_store %arg7[%c0_6, %c0_7], %7 {strides = array<i32>} : memref<256x16xf32, #tpu.memory_space<vmem>>, vector<256x16xf32>,
    %c0_i32_8 = arith.constant 0 : i32
    %9 = arith.cmpi eq, %arg1, %c0_i32_8 : i32
    %10 = arith.extui %9 : i1 to i32
    %c0_i32_9 = arith.constant 0 : i32
    %11 = arith.cmpi ne, %10, %c0_i32_9 : i32
    scf.if %11 {
      %c0_10 = arith.constant 0 : index
      %c0_11 = arith.constant 0 : index
      %12 = vector.load %arg7[%c0_10, %c0_11] : memref<256x16xf32, #tpu.memory_space<vmem>>, vector<256x16xf32>
      %c0_12 = arith.constant 0 : index
      %c0_13 = arith.constant 0 : index
      %13 = vector.load %arg4[%c0_12, %c0_13] : memref<1x16xf32, #tpu.memory_space<vmem>>, vector<1x16xf32>
      %14 = vector.broadcast %13 : vector<1x16xf32> to vector<256x16xf32>
      %15 = arith.mulf %12, %14 : vector<256x16xf32>
      %c0_14 = arith.constant 0 : index
      %c0_15 = arith.constant 0 : index
      %16 = vector.load %arg5[%c0_14, %c0_15] : memref<1x16xf32, #tpu.memory_space<vmem>>, vector<1x16xf32>
      %17 = vector.broadcast %16 : vector<1x16xf32> to vector<256x16xf32>
      %18 = arith.addf %15, %17 : vector<256x16xf32>
      %cst_16 = arith.constant 0.000000e+00 : f32
      %19 = vector.broadcast %cst_16 : f32 to vector<256x16xf32>
      %20 = arith.maximumf %18, %19 : vector<256x16xf32>
      %c0_17 = arith.constant 0 : index
      %c0_18 = arith.constant 0 : index
      %21 = vector.load %arg6[%c0_17, %c0_18] : memref<256x16xf32, #tpu.memory_space<vmem>>, vector<256x16xf32>
      tpu.vector_store %arg6[%c0_17, %c0_18], %20 {strides = array<i32>} : memref<256x16xf32, #tpu.memory_space<vmem>>, vector<256x16xf32>,
    } else {
    }
    return
  }
  func.func @transform_0(%arg0: i32, %arg1: i32) -> (i32, i32) {
    %c0_i32 = arith.constant 0 : i32
    return %arg0, %arg1 : i32, i32
  }
  func.func @transform_1(%arg0: i32, %arg1: i32) -> (i32, i32) {
    %c0_i32 = arith.constant 0 : i32
    %c0_i32_0 = arith.constant 0 : i32
    return %arg1, %c0_i32 : i32, i32
  }
  func.func @transform_2(%arg0: i32, %arg1: i32) -> (i32, i32) {
    %c0_i32 = arith.constant 0 : i32
    %c0_i32_0 = arith.constant 0 : i32
    %c0_i32_1 = arith.constant 0 : i32
    return %c0_i32, %c0_i32_0 : i32, i32
  }
  func.func @transform_3(%arg0: i32, %arg1: i32) -> (i32, i32) {
    %c0_i32 = arith.constant 0 : i32
    %c0_i32_0 = arith.constant 0 : i32
    %c0_i32_1 = arith.constant 0 : i32
    return %c0_i32, %c0_i32_0 : i32, i32
  }
  func.func @transform_4(%arg0: i32, %arg1: i32) -> (i32, i32) {
    %c0_i32 = arith.constant 0 : i32
    %c0_i32_0 = arith.constant 0 : i32
    return %arg0, %c0_i32 : i32, i32
  }
}

module attributes {stable_mosaic.version = 11 : i64} {
  func.func @_fused_matmul_kernel(%arg0: i32, %arg1: i32, %arg2: memref<128x144xbf16, #tpu.memory_space<vmem>>, %arg3: memref<144x16xbf16, #tpu.memory_space<vmem>>, %arg4: memref<1x16xf32, #tpu.memory_space<vmem>>, %arg5: memref<1x16xf32, #tpu.memory_space<vmem>>, %arg6: memref<128x16xf32, #tpu.memory_space<vmem>>, %arg7: memref<128x16xf32, #tpu.memory_space<vmem>>) attributes {dimension_semantics = [#tpu.dimension_semantics<parallel>, #tpu.dimension_semantics<arbitrary>], iteration_bounds = array<i64: 1, 1>, scalar_prefetch = 0 : i64, scratch_operands = 1 : i64, tpu.core_type = #tpu.core_type<tc>, window_params = [{transform_indices = @transform_0, window_bounds = array<i64: 128, 144>}, {transform_indices = @transform_1, window_bounds = array<i64: 144, 16>}, {pipeline_mode = #tpu.pipeline_mode<synchronous>, transform_indices = @transform_2, window_bounds = array<i64: 1, 16>}, {pipeline_mode = #tpu.pipeline_mode<synchronous>, transform_indices = @transform_3, window_bounds = array<i64: 1, 16>}, {transform_indices = @transform_4, window_bounds = array<i64: 128, 16>}]} {
    %c0_i32 = arith.constant 0 : i32
    %0 = arith.cmpi eq, %arg1, %c0_i32 : i32
    %1 = arith.extui %0 : i1 to i32
    %c0_i32_0 = arith.constant 0 : i32
    %2 = arith.cmpi ne, %1, %c0_i32_0 : i32
    scf.if %2 {
      %cst_10 = arith.constant 0.000000e+00 : f32
      %12 = vector.broadcast %cst_10 : f32 to vector<128x16xf32>
      %c0_11 = arith.constant 0 : index
      %c0_12 = arith.constant 0 : index
      %13 = vector.load %arg7[%c0_11, %c0_12] : memref<128x16xf32, #tpu.memory_space<vmem>>, vector<128x16xf32>
      tpu.vector_store %arg7[%c0_11, %c0_12], %12 {strides = array<i32>} : memref<128x16xf32, #tpu.memory_space<vmem>>, vector<128x16xf32>,
    } else {
    }
    %c0 = arith.constant 0 : index
    %c0_1 = arith.constant 0 : index
    %3 = vector.load %arg7[%c0, %c0_1] : memref<128x16xf32, #tpu.memory_space<vmem>>, vector<128x16xf32>
    %c0_2 = arith.constant 0 : index
    %c0_3 = arith.constant 0 : index
    %4 = vector.load %arg2[%c0_2, %c0_3] : memref<128x144xbf16, #tpu.memory_space<vmem>>, vector<128x144xbf16>
    %c0_4 = arith.constant 0 : index
    %c0_5 = arith.constant 0 : index
    %5 = vector.load %arg3[%c0_4, %c0_5] : memref<144x16xbf16, #tpu.memory_space<vmem>>, vector<144x16xbf16>
    %cst = arith.constant dense<0.000000e+00> : vector<128x16xf32>
    %6 = tpu.matmul %4, %5, %cst {dimension_numbers = #tpu.dot_dimension_numbers<[1], [0], [0], [1], [0, 0, 1, 1], [], []>} : vector<128x144xbf16>, vector<144x16xbf16>, vector<128x16xf32> -> vector<128x16xf32>
    %7 = arith.addf %3, %6 : vector<128x16xf32>
    %c0_6 = arith.constant 0 : index
    %c0_7 = arith.constant 0 : index
    %8 = vector.load %arg7[%c0_6, %c0_7] : memref<128x16xf32, #tpu.memory_space<vmem>>, vector<128x16xf32>
    tpu.vector_store %arg7[%c0_6, %c0_7], %7 {strides = array<i32>} : memref<128x16xf32, #tpu.memory_space<vmem>>, vector<128x16xf32>,
    %c0_i32_8 = arith.constant 0 : i32
    %9 = arith.cmpi eq, %arg1, %c0_i32_8 : i32
    %10 = arith.extui %9 : i1 to i32
    %c0_i32_9 = arith.constant 0 : i32
    %11 = arith.cmpi ne, %10, %c0_i32_9 : i32
    scf.if %11 {
      %c0_10 = arith.constant 0 : index
      %c0_11 = arith.constant 0 : index
      %12 = vector.load %arg7[%c0_10, %c0_11] : memref<128x16xf32, #tpu.memory_space<vmem>>, vector<128x16xf32>
      %c0_12 = arith.constant 0 : index
      %c0_13 = arith.constant 0 : index
      %13 = vector.load %arg4[%c0_12, %c0_13] : memref<1x16xf32, #tpu.memory_space<vmem>>, vector<1x16xf32>
      %14 = vector.broadcast %13 : vector<1x16xf32> to vector<128x16xf32>
      %15 = arith.mulf %12, %14 : vector<128x16xf32>
      %c0_14 = arith.constant 0 : index
      %c0_15 = arith.constant 0 : index
      %16 = vector.load %arg5[%c0_14, %c0_15] : memref<1x16xf32, #tpu.memory_space<vmem>>, vector<1x16xf32>
      %17 = vector.broadcast %16 : vector<1x16xf32> to vector<128x16xf32>
      %18 = arith.addf %15, %17 : vector<128x16xf32>
      %cst_16 = arith.constant 0.000000e+00 : f32
      %19 = vector.broadcast %cst_16 : f32 to vector<128x16xf32>
      %20 = arith.maximumf %18, %19 : vector<128x16xf32>
      %c0_17 = arith.constant 0 : index
      %c0_18 = arith.constant 0 : index
      %21 = vector.load %arg6[%c0_17, %c0_18] : memref<128x16xf32, #tpu.memory_space<vmem>>, vector<128x16xf32>
      tpu.vector_store %arg6[%c0_17, %c0_18], %20 {strides = array<i32>} : memref<128x16xf32, #tpu.memory_space<vmem>>, vector<128x16xf32>,
    } else {
    }
    return
  }
  func.func @transform_0(%arg0: i32, %arg1: i32) -> (i32, i32) {
    %c0_i32 = arith.constant 0 : i32
    return %arg0, %arg1 : i32, i32
  }
  func.func @transform_1(%arg0: i32, %arg1: i32) -> (i32, i32) {
    %c0_i32 = arith.constant 0 : i32
    %c0_i32_0 = arith.constant 0 : i32
    return %arg1, %c0_i32 : i32, i32
  }
  func.func @transform_2(%arg0: i32, %arg1: i32) -> (i32, i32) {
    %c0_i32 = arith.constant 0 : i32
    %c0_i32_0 = arith.constant 0 : i32
    %c0_i32_1 = arith.constant 0 : i32
    return %c0_i32, %c0_i32_0 : i32, i32
  }
  func.func @transform_3(%arg0: i32, %arg1: i32) -> (i32, i32) {
    %c0_i32 = arith.constant 0 : i32
    %c0_i32_0 = arith.constant 0 : i32
    %c0_i32_1 = arith.constant 0 : i32
    return %c0_i32, %c0_i32_0 : i32, i32
  }
  func.func @transform_4(%arg0: i32, %arg1: i32) -> (i32, i32) {
    %c0_i32 = arith.constant 0 : i32
    %c0_i32_0 = arith.constant 0 : i32
    return %arg0, %c0_i32 : i32, i32
  }
}

module attributes {stable_mosaic.version = 11 : i64} {
  func.func @_fused_matmul_kernel(%arg0: i32, %arg1: i32, %arg2: memref<128x32xbf16, #tpu.memory_space<vmem>>, %arg3: memref<32x64xbf16, #tpu.memory_space<vmem>>, %arg4: memref<1x64xf32, #tpu.memory_space<vmem>>, %arg5: memref<1x64xf32, #tpu.memory_space<vmem>>, %arg6: memref<128x64xf32, #tpu.memory_space<vmem>>, %arg7: memref<128x64xf32, #tpu.memory_space<vmem>>) attributes {dimension_semantics = [#tpu.dimension_semantics<parallel>, #tpu.dimension_semantics<arbitrary>], iteration_bounds = array<i64: 1, 1>, scalar_prefetch = 0 : i64, scratch_operands = 1 : i64, tpu.core_type = #tpu.core_type<tc>, window_params = [{transform_indices = @transform_0, window_bounds = array<i64: 128, 32>}, {transform_indices = @transform_1, window_bounds = array<i64: 32, 64>}, {pipeline_mode = #tpu.pipeline_mode<synchronous>, transform_indices = @transform_2, window_bounds = array<i64: 1, 64>}, {pipeline_mode = #tpu.pipeline_mode<synchronous>, transform_indices = @transform_3, window_bounds = array<i64: 1, 64>}, {transform_indices = @transform_4, window_bounds = array<i64: 128, 64>}]} {
    %c0_i32 = arith.constant 0 : i32
    %0 = arith.cmpi eq, %arg1, %c0_i32 : i32
    %1 = arith.extui %0 : i1 to i32
    %c0_i32_0 = arith.constant 0 : i32
    %2 = arith.cmpi ne, %1, %c0_i32_0 : i32
    scf.if %2 {
      %cst_10 = arith.constant 0.000000e+00 : f32
      %12 = vector.broadcast %cst_10 : f32 to vector<128x64xf32>
      %c0_11 = arith.constant 0 : index
      %c0_12 = arith.constant 0 : index
      %13 = vector.load %arg7[%c0_11, %c0_12] : memref<128x64xf32, #tpu.memory_space<vmem>>, vector<128x64xf32>
      tpu.vector_store %arg7[%c0_11, %c0_12], %12 {strides = array<i32>} : memref<128x64xf32, #tpu.memory_space<vmem>>, vector<128x64xf32>,
    } else {
    }
    %c0 = arith.constant 0 : index
    %c0_1 = arith.constant 0 : index
    %3 = vector.load %arg7[%c0, %c0_1] : memref<128x64xf32, #tpu.memory_space<vmem>>, vector<128x64xf32>
    %c0_2 = arith.constant 0 : index
    %c0_3 = arith.constant 0 : index
    %4 = vector.load %arg2[%c0_2, %c0_3] : memref<128x32xbf16, #tpu.memory_space<vmem>>, vector<128x32xbf16>
    %c0_4 = arith.constant 0 : index
    %c0_5 = arith.constant 0 : index
    %5 = vector.load %arg3[%c0_4, %c0_5] : memref<32x64xbf16, #tpu.memory_space<vmem>>, vector<32x64xbf16>
    %cst = arith.constant dense<0.000000e+00> : vector<128x64xf32>
    %6 = tpu.matmul %4, %5, %cst {dimension_numbers = #tpu.dot_dimension_numbers<[1], [0], [0], [1], [0, 0, 1, 1], [], []>} : vector<128x32xbf16>, vector<32x64xbf16>, vector<128x64xf32> -> vector<128x64xf32>
    %7 = arith.addf %3, %6 : vector<128x64xf32>
    %c0_6 = arith.constant 0 : index
    %c0_7 = arith.constant 0 : index
    %8 = vector.load %arg7[%c0_6, %c0_7] : memref<128x64xf32, #tpu.memory_space<vmem>>, vector<128x64xf32>
    tpu.vector_store %arg7[%c0_6, %c0_7], %7 {strides = array<i32>} : memref<128x64xf32, #tpu.memory_space<vmem>>, vector<128x64xf32>,
    %c0_i32_8 = arith.constant 0 : i32
    %9 = arith.cmpi eq, %arg1, %c0_i32_8 : i32
    %10 = arith.extui %9 : i1 to i32
    %c0_i32_9 = arith.constant 0 : i32
    %11 = arith.cmpi ne, %10, %c0_i32_9 : i32
    scf.if %11 {
      %c0_10 = arith.constant 0 : index
      %c0_11 = arith.constant 0 : index
      %12 = vector.load %arg7[%c0_10, %c0_11] : memref<128x64xf32, #tpu.memory_space<vmem>>, vector<128x64xf32>
      %c0_12 = arith.constant 0 : index
      %c0_13 = arith.constant 0 : index
      %13 = vector.load %arg4[%c0_12, %c0_13] : memref<1x64xf32, #tpu.memory_space<vmem>>, vector<1x64xf32>
      %14 = vector.broadcast %13 : vector<1x64xf32> to vector<128x64xf32>
      %15 = arith.mulf %12, %14 : vector<128x64xf32>
      %c0_14 = arith.constant 0 : index
      %c0_15 = arith.constant 0 : index
      %16 = vector.load %arg5[%c0_14, %c0_15] : memref<1x64xf32, #tpu.memory_space<vmem>>, vector<1x64xf32>
      %17 = vector.broadcast %16 : vector<1x64xf32> to vector<128x64xf32>
      %18 = arith.addf %15, %17 : vector<128x64xf32>
      %c0_16 = arith.constant 0 : index
      %c0_17 = arith.constant 0 : index
      %19 = vector.load %arg6[%c0_16, %c0_17] : memref<128x64xf32, #tpu.memory_space<vmem>>, vector<128x64xf32>
      tpu.vector_store %arg6[%c0_16, %c0_17], %18 {strides = array<i32>} : memref<128x64xf32, #tpu.memory_space<vmem>>, vector<128x64xf32>,
    } else {
    }
    return
  }
  func.func @transform_0(%arg0: i32, %arg1: i32) -> (i32, i32) {
    %c0_i32 = arith.constant 0 : i32
    return %arg0, %arg1 : i32, i32
  }
  func.func @transform_1(%arg0: i32, %arg1: i32) -> (i32, i32) {
    %c0_i32 = arith.constant 0 : i32
    %c0_i32_0 = arith.constant 0 : i32
    return %arg1, %c0_i32 : i32, i32
  }
  func.func @transform_2(%arg0: i32, %arg1: i32) -> (i32, i32) {
    %c0_i32 = arith.constant 0 : i32
    %c0_i32_0 = arith.constant 0 : i32
    %c0_i32_1 = arith.constant 0 : i32
    return %c0_i32, %c0_i32_0 : i32, i32
  }
  func.func @transform_3(%arg0: i32, %arg1: i32) -> (i32, i32) {
    %c0_i32 = arith.constant 0 : i32
    %c0_i32_0 = arith.constant 0 : i32
    %c0_i32_1 = arith.constant 0 : i32
    return %c0_i32, %c0_i32_0 : i32, i32
  }
  func.func @transform_4(%arg0: i32, %arg1: i32) -> (i32, i32) {
    %c0_i32 = arith.constant 0 : i32
    %c0_i32_0 = arith.constant 0 : i32
    return %arg0, %c0_i32 : i32, i32
  }
}

module attributes {stable_mosaic.version = 11 : i64} {
  func.func @_fused_matmul_kernel(%arg0: i32, %arg1: i32, %arg2: memref<128x16xbf16, #tpu.memory_space<vmem>>, %arg3: memref<16x64xbf16, #tpu.memory_space<vmem>>, %arg4: memref<1x64xf32, #tpu.memory_space<vmem>>, %arg5: memref<1x64xf32, #tpu.memory_space<vmem>>, %arg6: memref<128x64xf32, #tpu.memory_space<vmem>>, %arg7: memref<128x64xf32, #tpu.memory_space<vmem>>, %arg8: memref<128x64xf32, #tpu.memory_space<vmem>>) attributes {dimension_semantics = [#tpu.dimension_semantics<parallel>, #tpu.dimension_semantics<arbitrary>], iteration_bounds = array<i64: 1, 1>, scalar_prefetch = 0 : i64, scratch_operands = 1 : i64, tpu.core_type = #tpu.core_type<tc>, window_params = [{transform_indices = @transform_0, window_bounds = array<i64: 128, 16>}, {transform_indices = @transform_1, window_bounds = array<i64: 16, 64>}, {pipeline_mode = #tpu.pipeline_mode<synchronous>, transform_indices = @transform_2, window_bounds = array<i64: 1, 64>}, {pipeline_mode = #tpu.pipeline_mode<synchronous>, transform_indices = @transform_3, window_bounds = array<i64: 1, 64>}, {transform_indices = @transform_4, window_bounds = array<i64: 128, 64>}, {transform_indices = @transform_5, window_bounds = array<i64: 128, 64>}]} {
    %c0_i32 = arith.constant 0 : i32
    %0 = arith.cmpi eq, %arg1, %c0_i32 : i32
    %1 = arith.extui %0 : i1 to i32
    %c0_i32_0 = arith.constant 0 : i32
    %2 = arith.cmpi ne, %1, %c0_i32_0 : i32
    scf.if %2 {
      %cst_10 = arith.constant 0.000000e+00 : f32
      %12 = vector.broadcast %cst_10 : f32 to vector<128x64xf32>
      %c0_11 = arith.constant 0 : index
      %c0_12 = arith.constant 0 : index
      %13 = vector.load %arg8[%c0_11, %c0_12] : memref<128x64xf32, #tpu.memory_space<vmem>>, vector<128x64xf32>
      tpu.vector_store %arg8[%c0_11, %c0_12], %12 {strides = array<i32>} : memref<128x64xf32, #tpu.memory_space<vmem>>, vector<128x64xf32>,
    } else {
    }
    %c0 = arith.constant 0 : index
    %c0_1 = arith.constant 0 : index
    %3 = vector.load %arg8[%c0, %c0_1] : memref<128x64xf32, #tpu.memory_space<vmem>>, vector<128x64xf32>
    %c0_2 = arith.constant 0 : index
    %c0_3 = arith.constant 0 : index
    %4 = vector.load %arg2[%c0_2, %c0_3] : memref<128x16xbf16, #tpu.memory_space<vmem>>, vector<128x16xbf16>
    %c0_4 = arith.constant 0 : index
    %c0_5 = arith.constant 0 : index
    %5 = vector.load %arg3[%c0_4, %c0_5] : memref<16x64xbf16, #tpu.memory_space<vmem>>, vector<16x64xbf16>
    %cst = arith.constant dense<0.000000e+00> : vector<128x64xf32>
    %6 = tpu.matmul %4, %5, %cst {dimension_numbers = #tpu.dot_dimension_numbers<[1], [0], [0], [1], [0, 0, 1, 1], [], []>} : vector<128x16xbf16>, vector<16x64xbf16>, vector<128x64xf32> -> vector<128x64xf32>
    %7 = arith.addf %3, %6 : vector<128x64xf32>
    %c0_6 = arith.constant 0 : index
    %c0_7 = arith.constant 0 : index
    %8 = vector.load %arg8[%c0_6, %c0_7] : memref<128x64xf32, #tpu.memory_space<vmem>>, vector<128x64xf32>
    tpu.vector_store %arg8[%c0_6, %c0_7], %7 {strides = array<i32>} : memref<128x64xf32, #tpu.memory_space<vmem>>, vector<128x64xf32>,
    %c0_i32_8 = arith.constant 0 : i32
    %9 = arith.cmpi eq, %arg1, %c0_i32_8 : i32
    %10 = arith.extui %9 : i1 to i32
    %c0_i32_9 = arith.constant 0 : i32
    %11 = arith.cmpi ne, %10, %c0_i32_9 : i32
    scf.if %11 {
      %c0_10 = arith.constant 0 : index
      %c0_11 = arith.constant 0 : index
      %12 = vector.load %arg8[%c0_10, %c0_11] : memref<128x64xf32, #tpu.memory_space<vmem>>, vector<128x64xf32>
      %c0_12 = arith.constant 0 : index
      %c0_13 = arith.constant 0 : index
      %13 = vector.load %arg4[%c0_12, %c0_13] : memref<1x64xf32, #tpu.memory_space<vmem>>, vector<1x64xf32>
      %14 = vector.broadcast %13 : vector<1x64xf32> to vector<128x64xf32>
      %15 = arith.mulf %12, %14 : vector<128x64xf32>
      %c0_14 = arith.constant 0 : index
      %c0_15 = arith.constant 0 : index
      %16 = vector.load %arg5[%c0_14, %c0_15] : memref<1x64xf32, #tpu.memory_space<vmem>>, vector<1x64xf32>
      %17 = vector.broadcast %16 : vector<1x64xf32> to vector<128x64xf32>
      %18 = arith.addf %15, %17 : vector<128x64xf32>
      %c0_16 = arith.constant 0 : index
      %c0_17 = arith.constant 0 : index
      %19 = vector.load %arg6[%c0_16, %c0_17] : memref<128x64xf32, #tpu.memory_space<vmem>>, vector<128x64xf32>
      %20 = arith.addf %18, %19 : vector<128x64xf32>
      %cst_18 = arith.constant 0.000000e+00 : f32
      %21 = vector.broadcast %cst_18 : f32 to vector<128x64xf32>
      %22 = arith.maximumf %20, %21 : vector<128x64xf32>
      %c0_19 = arith.constant 0 : index
      %c0_20 = arith.constant 0 : index
      %23 = vector.load %arg7[%c0_19, %c0_20] : memref<128x64xf32, #tpu.memory_space<vmem>>, vector<128x64xf32>
      tpu.vector_store %arg7[%c0_19, %c0_20], %22 {strides = array<i32>} : memref<128x64xf32, #tpu.memory_space<vmem>>, vector<128x64xf32>,
    } else {
    }
    return
  }
  func.func @transform_0(%arg0: i32, %arg1: i32) -> (i32, i32) {
    %c0_i32 = arith.constant 0 : i32
    return %arg0, %arg1 : i32, i32
  }
  func.func @transform_1(%arg0: i32, %arg1: i32) -> (i32, i32) {
    %c0_i32 = arith.constant 0 : i32
    %c0_i32_0 = arith.constant 0 : i32
    return %arg1, %c0_i32 : i32, i32
  }
  func.func @transform_2(%arg0: i32, %arg1: i32) -> (i32, i32) {
    %c0_i32 = arith.constant 0 : i32
    %c0_i32_0 = arith.constant 0 : i32
    %c0_i32_1 = arith.constant 0 : i32
    return %c0_i32, %c0_i32_0 : i32, i32
  }
  func.func @transform_3(%arg0: i32, %arg1: i32) -> (i32, i32) {
    %c0_i32 = arith.constant 0 : i32
    %c0_i32_0 = arith.constant 0 : i32
    %c0_i32_1 = arith.constant 0 : i32
    return %c0_i32, %c0_i32_0 : i32, i32
  }
  func.func @transform_4(%arg0: i32, %arg1: i32) -> (i32, i32) {
    %c0_i32 = arith.constant 0 : i32
    %c0_i32_0 = arith.constant 0 : i32
    return %arg0, %c0_i32 : i32, i32
  }
  func.func @transform_5(%arg0: i32, %arg1: i32) -> (i32, i32) {
    %c0_i32 = arith.constant 0 : i32
    %c0_i32_0 = arith.constant 0 : i32
    return %arg0, %c0_i32 : i32, i32
  }
}

</mosaic_0001>

<bundles_post_ra>
// kernel: complex_block_forward.5
= control target key start
LH: loop header
LB: loop body
LE: loop exit
PB: predicated region body
PF: predicated region fallthrough
CT: control target
= control target key end

     0   :  { %s1178_s15 = smov 0   ;;  %s1180_s16 = smov 0   ;;  %s1459_s0 = inlined_call_operand.vmem [shape: bf16[512,32], index: 0, kind: input, shape index: {}]   ;;  %s1460_s1 = inlined_call_operand.vmem [shape: bf16[32,16], index: 1, kind: input, shape index: {}]   ;;  %s1461_s2 = inlined_call_operand.vmem [shape: f32[1,16], index: 2, kind: input, shape index: {}]   ;;  %s1462_s3 = inlined_call_operand.vmem [shape: f32[1,16], index: 3, kind: input, shape index: {}]   ;;  %s1463_s4 = inlined_call_operand.vmem [shape: f32[512,16], index: 4, kind: output, shape index: {}]  }
   0x1   :  { %s1182_s17 = smov 0  }
   0x2 LB: > { %s26_s18 = sadd.s32 1, %s1146_s16  ;;  %p984_p0 = scmp.ge.s32.totalorder %s1150_s17, 1  ;;  %s1150_s17 = sphi %s1182_s17, %s14_s17   ;;  %s1146_s16 = sphi %s1180_s16, %s1465_s16   ;;  %s1142_s15 = sphi %s1178_s15, %s1464_s15  }
   0x3   : > { %p28_p1 = scmp.ge.s32.totalorder %s26_s18, 2  ;;  %p191_p2 = scmp.lt.s32.totalorder %s1150_s17, 3 }
   0x5   : > { %s1467_s18 = smov (%p28_p1, %s26_s18), 0  ;;  %p192_p3 = pnand %p984_p0, %p191_p2 }
   0x6   : > { %v1110_v0 = vld [vmem:[%s1460_s1] sm:$0xff] (!%p192_p3)   ;;  %s985_s21 = sshll.u32 (!%p192_p3), %s1142_s15, 5  ;;  %v1111_v1 = vld [vmem:[%s1460_s1 + $0x8] sm:$0xff] (!%p192_p3)   ;;  %vm251_vm0 = vcmask (!%p192_p3), 130048   ;;  %v1152_v2 = vmov (!%p192_p3), 0.0   ;;  %vm444_vm1 = vcmask (!%p192_p3), 261120  }
   0x7   : > { %195 = sbr.rel (%p192_p3) target bundleno = 279 (0x117), region = 36  ;;  %p226_p4 = scmp.lt.s32.totalorder (!%p192_p3), %s985_s21, 63  ;;  %1045 = vmatprep.subr.bf16.mxu0 (!%p192_p3), %v1110_v0  ;;  %1081 = vmatprep.subr.bf16.mxu1 (!%p192_p3), %v1110_v0  ;;  %254 = vst.msk [vmem:[#allocation2 + $0x10] sm:$0xff] (!%p192_p3), %vm251_vm0, %v1152_v2  ;;  %252 = vst.msk [vmem:[#allocation2] sm:$0xff] (!%p192_p3), %vm251_vm0, %v1152_v2  ;;  %v1285_v46 = vld [vmem:[%s1461_s2] ss:$0 sm:$0xff] (!%p192_p3) }
   0x8   : > { %1046 = vmatpush3.bf16.msra.mxu0 (!%p192_p3), %v1110_v0  ;;  %1083 = vmatpush3.bf16.msra.mxu1 (!%p192_p3), %v1110_v0  ;;  %253 = vst.msk [vmem:[#allocation2 + $0x8] sm:$0xff] (!%p192_p3), %vm251_vm0, %v1152_v2  ;;  %255 = vst.msk [vmem:[#allocation2 + $0x18] sm:$0xff] (!%p192_p3), %vm251_vm0, %v1152_v2  ;;  %v1290_v56 = vld [vmem:[%s1462_s3] ss:$0 sm:$0xff] (!%p192_p3) }
   0x9   : > { %256 = vst.msk [vmem:[#allocation2 + $0x20] sm:$0xff] (!%p192_p3), %vm251_vm0, %v1152_v2  ;;  %257 = vst.msk [vmem:[#allocation2 + $0x28] sm:$0xff] (!%p192_p3), %vm251_vm0, %v1152_v2  ;;  %1047 = vmatprep.subr.bf16.mxu0 (!%p192_p3), %v1111_v1  ;;  %1082 = vmatprep.subr.bf16.mxu1 (!%p192_p3), %v1111_v1 }
   0xa   : > { %258 = vst.msk [vmem:[#allocation2 + $0x30] sm:$0xff] (!%p192_p3), %vm251_vm0, %v1152_v2  ;;  %259 = vst.msk [vmem:[#allocation2 + $0x38] sm:$0xff] (!%p192_p3), %vm251_vm0, %v1152_v2 }
   0xb   : > { %260 = vst.msk [vmem:[#allocation2 + $0x40] sm:$0xff] (!%p192_p3), %vm251_vm0, %v1152_v2  ;;  %261 = vst.msk [vmem:[#allocation2 + $0x48] sm:$0xff] (!%p192_p3), %vm251_vm0, %v1152_v2 }
   0xc   : > { %262 = vst.msk [vmem:[#allocation2 + $0x50] sm:$0xff] (!%p192_p3), %vm251_vm0, %v1152_v2  ;;  %263 = vst.msk [vmem:[#allocation2 + $0x58] sm:$0xff] (!%p192_p3), %vm251_vm0, %v1152_v2  ;;  %1048 = vmatpush3.bf16.msra.mxu0 (!%p192_p3), %v1111_v1  ;;  %1084 = vmatpush3.bf16.msra.mxu1 (!%p192_p3), %v1111_v1 }
   0xd   : > { %264 = vst.msk [vmem:[#allocation2 + $0x60] sm:$0xff] (!%p192_p3), %vm251_vm0, %v1152_v2  ;;  %265 = vst.msk [vmem:[#allocation2 + $0x68] sm:$0xff] (!%p192_p3), %vm251_vm0, %v1152_v2 }
   0xe   : > { %s1469_s21 = smov (!%p226_p4, %s985_s21), 63  ;;  %266 = vst.msk [vmem:[#allocation2 + $0x70] sm:$0xff] %vm251_vm0, %v1152_v2  ;;  %267 = vst.msk [vmem:[#allocation2 + $0x78] sm:$0xff] %vm251_vm0, %v1152_v2  ;;  %v286_v19 = vld [vmem:[#allocation2 + $0x10] sm:$0xff]  ;;  %v284_v21 = vld [vmem:[#allocation2] sm:$0xff] }
   0xf   : > { %268 = vst.msk [vmem:[#allocation2 + $0x80] sm:$0xff] %vm251_vm0, %v1152_v2  ;;  %269 = vst.msk [vmem:[#allocation2 + $0x88] sm:$0xff] %vm251_vm0, %v1152_v2  ;;  %s986_s24 = sshll.u32 %s1469_s21, 2  ;;  %v287_v24 = vld [vmem:[#allocation2 + $0x18] sm:$0xff]  ;;  %v285_v29 = vld [vmem:[#allocation2 + $0x8] sm:$0xff]  ;;  %s988_s6 = sshll.u32 %s1469_s21, 3 }
  0x10   : > { %270 = vst.msk [vmem:[#allocation2 + $0x90] sm:$0xff] %vm251_vm0, %v1152_v2  ;;  %271 = vst.msk [vmem:[#allocation2 + $0x98] sm:$0xff] %vm251_vm0, %v1152_v2  ;;  %s1240_s27 = scalar_lea.vmem %s1459_s0, %s986_s24  ;;  %v288_v45 = vld [vmem:[#allocation2 + $0x20] sm:$0xff]  ;;  %v289_v54 = vld [vmem:[#allocation2 + $0x28] sm:$0xff]  ;;  %s1307_s9 = scalar_lea.vmem %s1463_s4, %s988_s6 }
  0x11   : > { %272 = vst.msk [vmem:[#allocation2 + $0xa0] sm:$0xff] %vm251_vm0, %v1152_v2  ;;  %273 = vst.msk [vmem:[#allocation2 + $0xa8] sm:$0xff] %vm251_vm0, %v1152_v2  ;;  %v1112_v3 = vld [vmem:[%s1240_s27] sm:$0xff]   ;;  %v1114_v5 = vld [vmem:[%s1240_s27 + $0x8] sm:$0xff]  }
  0x12   : > { %274 = vst.msk [vmem:[#allocation2 + $0xb0] sm:$0xff] %vm251_vm0, %v1152_v2  ;;  %275 = vst.msk [vmem:[#allocation2 + $0xb8] sm:$0xff] %vm251_vm0, %v1152_v2  ;;  %v1113_v4 = vld [vmem:[%s1240_s27 + $0x40] sm:$0xff]   ;;  %1049 = vmatprep.mubr.msk.bf16.mxu0 %vm444_vm1, %v1112_v3  ;;  %v1115_v6 = vld [vmem:[%s1240_s27 + $0x48] sm:$0xff]  }
  0x13   : > { %276 = vst.msk [vmem:[#allocation2 + $0xc0] sm:$0xff] %vm251_vm0, %v1152_v2  ;;  %277 = vst.msk [vmem:[#allocation2 + $0xc8] sm:$0xff] %vm251_vm0, %v1152_v2  ;;  %1065 = vmatprep.mubr.msk.bf16.mxu1 %vm444_vm1, %v1113_v4  ;;  %1050 = vmatmul.mubr.msk.bf16.vlgmr.msra.gmra.mrb[0].mxu0 %vm444_vm1, %v1114_v5  ;;  %v1116_v7 = vld [vmem:[%s1240_s27 + $0x10] sm:$0xff]   ;;  %v1118_v9 = vld [vmem:[%s1240_s27 + $0x18] sm:$0xff]  }
  0x14   : > { %278 = vst.msk [vmem:[#allocation2 + $0xd0] sm:$0xff] %vm251_vm0, %v1152_v2  ;;  %279 = vst.msk [vmem:[#allocation2 + $0xd8] sm:$0xff] %vm251_vm0, %v1152_v2  ;;  %1066 = vmatmul.mubr.msk.bf16.vlgmr.msra.gmra.mrb[0].mxu1 %vm444_vm1, %v1115_v6  ;;  %v1117_v8 = vld [vmem:[%s1240_s27 + $0x50] sm:$0xff]   ;;  %1053 = vmatprep.mubr.msk.bf16.mxu0 %vm444_vm1, %v1116_v7  ;;  %v1119_v10 = vld [vmem:[%s1240_s27 + $0x58] sm:$0xff]  }
  0x15   : > { %280 = vst.msk [vmem:[#allocation2 + $0xe0] sm:$0xff] %vm251_vm0, %v1152_v2  ;;  %281 = vst.msk [vmem:[#allocation2 + $0xe8] sm:$0xff] %vm251_vm0, %v1152_v2  ;;  %1069 = vmatprep.mubr.msk.bf16.mxu1 %vm444_vm1, %v1117_v8  ;;  %v1120_v11 = vld [vmem:[%s1240_s27 + $0x20] sm:$0xff]   ;;  %v1122_v13 = vld [vmem:[%s1240_s27 + $0x28] sm:$0xff]  }
  0x16   : > { %282 = vst.msk [vmem:[#allocation2 + $0xf0] sm:$0xff] %vm251_vm0, %v1152_v2  ;;  %283 = vst.msk [vmem:[#allocation2 + $0xf8] sm:$0xff] %vm251_vm0, %v1152_v2  ;;  %v1121_v12 = vld [vmem:[%s1240_s27 + $0x60] sm:$0xff]   ;;  %v1123_v14 = vld [vmem:[%s1240_s27 + $0x68] sm:$0xff]  }
  0x17   : > { %v1124_v15 = vld [vmem:[%s1240_s27 + $0x30] sm:$0xff]   ;;  %v1126_v17 = vld [vmem:[%s1240_s27 + $0x38] sm:$0xff]   ;;  %v300_v23 = vld [vmem:[#allocation2 + $0x80] sm:$0xff] }
  0x18   : > { %v1125_v16 = vld [vmem:[%s1240_s27 + $0x70] sm:$0xff]   ;;  %v1127_v18 = vld [vmem:[%s1240_s27 + $0x78] sm:$0xff]   ;;  %v301_v34 = vld [vmem:[#allocation2 + $0x88] sm:$0xff] }
  0x19   : > { %v302_v20 = vld [vmem:[#allocation2 + $0x90] sm:$0xff]  ;;  %v303_v28 = vld [vmem:[#allocation2 + $0x98] sm:$0xff]  ;;  %v304_v48 = vld [vmem:[#allocation2 + $0xa0] sm:$0xff] }
  0x1a   : > { %v290_v43 = vld [vmem:[#allocation2 + $0x30] sm:$0xff]  ;;  %v291_v49 = vld [vmem:[#allocation2 + $0x38] sm:$0xff]  ;;  %v305_v61 = vld [vmem:[#allocation2 + $0xa8] sm:$0xff] }
  0x1b   : > { %1054 = vmatmul.mubr.msk.bf16.gmra.mrb[4].mxu0 %vm444_vm1, %v1118_v9  ;;  %v306_v44 = vld [vmem:[#allocation2 + $0xb0] sm:$0xff]  ;;  %v307_v53 = vld [vmem:[#allocation2 + $0xb8] sm:$0xff] }
  0x1c   : > { %1070 = vmatmul.mubr.msk.bf16.gmra.mrb[4].mxu1 %vm444_vm1, %v1119_v10  ;;  %1057 = vmatprep.mubr.msk.bf16.mxu0 %vm444_vm1, %v1120_v11 }
  0x1d   : > { %1073 = vmatprep.mubr.msk.bf16.mxu1 %vm444_vm1, %v1121_v12 }
  0x23   : > { %1058 = vmatmul.mubr.msk.bf16.gmra.mrb[8].mxu0 %vm444_vm1, %v1122_v13 }
  0x24   : > { %1074 = vmatmul.mubr.msk.bf16.gmra.mrb[8].mxu1 %vm444_vm1, %v1123_v14  ;;  %1061 = vmatprep.mubr.msk.bf16.mxu0 %vm444_vm1, %v1124_v15 }
  0x25   : > { %1077 = vmatprep.mubr.msk.bf16.mxu1 %vm444_vm1, %v1125_v16 }
  0x2b   : > { %1062 = vmatmul.mubr.msk.bf16.gmra.mrb[12].mxu0 %vm444_vm1, %v1126_v17 }
  0x2c   : > { %1078 = vmatmul.mubr.msk.bf16.gmra.mrb[12].mxu1 %vm444_vm1, %v1127_v18 }
  0xe6   : > { %v1051_v22 = vpop.f32.mrb[0].mxu0 }
  0xe7   : > { %v656_v25 = vadd.f32 %v1051_v22, %v286_v19  ;;  %v1067_v26 = vpop.f32.mrb[0].mxu1  ;;  %v527_v27 = vpop.f32.mrb[1].mxu0 }
  0xe8   : > { %v672_v30 = vadd.f32 %v1067_v26, %v302_v20  ;;  %v654_v31 = vadd.f32 %v527_v27, %v284_v21  ;;  %v591_v32 = vpop.f32.mrb[1].mxu1  ;;  %v1052_v33 = vpop.f32.mrb[2].mxu0 }
  0xe9   : > { %689 = vst.msk [vmem:[#allocation2 + $0x10] sm:$0xff] %vm251_vm0, %v656_v25  ;;  %v670_v35 = vadd.f32 %v591_v32, %v300_v23  ;;  %v657_v36 = vadd.f32 %v1052_v33, %v287_v24  ;;  %v1068_v37 = vpop.f32.mrb[2].mxu1  ;;  %v530_v38 = vpop.f32.mrb[3].mxu0  ;;  %v294_v23 = vld [vmem:[#allocation2 + $0x50] sm:$0xff] }
  0xea   : > { %705 = vst.msk [vmem:[#allocation2 + $0x90] sm:$0xff] %vm251_vm0, %v672_v30  ;;  %687 = vst.msk [vmem:[#allocation2] sm:$0xff] %vm251_vm0, %v654_v31  ;;  %v673_v39 = vadd.f32 %v1068_v37, %v303_v28  ;;  %v655_v40 = vadd.f32 %v530_v38, %v285_v29  ;;  %v594_v41 = vpop.f32.mrb[3].mxu1  ;;  %v310_v28 = vld [vmem:[#allocation2 + $0xd0] sm:$0xff]  ;;  %v292_v29 = vld [vmem:[#allocation2 + $0x40] sm:$0xff] }
  0xeb   : > { %703 = vst.msk [vmem:[#allocation2 + $0x80] sm:$0xff] %vm251_vm0, %v670_v35  ;;  %690 = vst.msk [vmem:[#allocation2 + $0x18] sm:$0xff] %vm251_vm0, %v657_v36  ;;  %v671_v42 = vadd.f32 %v594_v41, %v301_v34  ;;  %v308_v35 = vld [vmem:[#allocation2 + $0xc0] sm:$0xff]  ;;  %v295_v36 = vld [vmem:[#allocation2 + $0x58] sm:$0xff] }
  0xec   : > { %706 = vst.msk [vmem:[#allocation2 + $0x98] sm:$0xff] %vm251_vm0, %v673_v39  ;;  %688 = vst.msk [vmem:[#allocation2 + $0x8] sm:$0xff] %vm251_vm0, %v655_v40 }
  0xed   : > { %704 = vst.msk [vmem:[#allocation2 + $0x88] sm:$0xff] %vm251_vm0, %v671_v42 }
  0xee   : > { %v1055_v47 = vpop.f32.mrb[4].mxu0 }
  0xef   : > { %v660_v50 = vadd.f32 %v1055_v47, %v290_v43  ;;  %v1071_v51 = vpop.f32.mrb[4].mxu1  ;;  %v543_v52 = vpop.f32.mrb[5].mxu0  ;;  %v311_v43 = vld [vmem:[#allocation2 + $0xd8] sm:$0xff] }
  0xf0   : > { %v724_v55 = vld [vmem:[#allocation2 + $0x10] sm:$0xff]  ;;  %v676_v57 = vadd.f32 %v1071_v51, %v306_v44  ;;  %v658_v58 = vadd.f32 %v543_v52, %v288_v45  ;;  %v607_v59 = vpop.f32.mrb[5].mxu1  ;;  %v1056_v60 = vpop.f32.mrb[6].mxu0  ;;  %v293_v44 = vld [vmem:[#allocation2 + $0x48] sm:$0xff] }
  0xf1   : > { %v763_v62 = vmul.f32 %v1285_v46, %v724_v55  ;;  %v740_v63 = vld [vmem:[#allocation2 + $0x90] sm:$0xff]  ;;  %v722_v0 = vld [vmem:[#allocation2] sm:$0xff]  ;;  %693 = vst.msk [vmem:[#allocation2 + $0x30] sm:$0xff] %vm251_vm0, %v660_v50  ;;  %v674_v1 = vadd.f32 %v607_v59, %v304_v48  ;;  %v661_v2 = vadd.f32 %v1056_v60, %v291_v49  ;;  %v1072_v3 = vpop.f32.mrb[6].mxu1  ;;  %v546_v4 = vpop.f32.mrb[7].mxu0 }
  0xf2   : > { %v779_v5 = vmul.f32 %v1285_v46, %v740_v63  ;;  %v761_v6 = vmul.f32 %v1285_v46, %v722_v0  ;;  %v738_v7 = vld [vmem:[#allocation2 + $0x80] sm:$0xff]  ;;  %v725_v8 = vld [vmem:[#allocation2 + $0x18] sm:$0xff]  ;;  %709 = vst.msk [vmem:[#allocation2 + $0xb0] sm:$0xff] %vm251_vm0, %v676_v57  ;;  %691 = vst.msk [vmem:[#allocation2 + $0x20] sm:$0xff] %vm251_vm0, %v658_v58  ;;  %v677_v9 = vadd.f32 %v1072_v3, %v307_v53  ;;  %v610_v11 = vpop.f32.mrb[7].mxu1 }
  0xf3   : > { %v659_v10 = vadd.f32 %v546_v4, %v289_v54  ;;  %v802_v12 = vadd.f32 %v1290_v56, %v763_v62  ;;  %v777_v13 = vmul.f32 %v1285_v46, %v738_v7  ;;  %v764_v14 = vmul.f32 %v1285_v46, %v725_v8  ;;  %v741_v15 = vld [vmem:[#allocation2 + $0x98] sm:$0xff]  ;;  %v723_v16 = vld [vmem:[#allocation2 + $0x8] sm:$0xff]  ;;  %707 = vst.msk [vmem:[#allocation2 + $0xa0] sm:$0xff] %vm251_vm0, %v674_v1 }
  0xf4   : > { %694 = vst.msk [vmem:[#allocation2 + $0x38] sm:$0xff] %vm251_vm0, %v661_v2  ;;  %v675_v17 = vadd.f32 %v610_v11, %v305_v61  ;;  %v818_v18 = vadd.f32 %v1290_v56, %v779_v5  ;;  %v800_v19 = vadd.f32 %v1290_v56, %v761_v6  ;;  %v780_v20 = vmul.f32 %v1285_v46, %v741_v15  ;;  %v739_v22 = vld [vmem:[#allocation2 + $0x88] sm:$0xff] }
  0xf5   : > { %v762_v21 = vmul.f32 %v1285_v46, %v723_v16  ;;  %710 = vst.msk [vmem:[#allocation2 + $0xb8] sm:$0xff] %vm251_vm0, %v677_v9  ;;  %692 = vst.msk [vmem:[#allocation2 + $0x28] sm:$0xff] %vm251_vm0, %v659_v10  ;;  %v834_v24 = vmax.f32 %v802_v12, 0.0  ;;  %v816_v25 = vadd.f32 %v1290_v56, %v777_v13  ;;  %v803_v26 = vadd.f32 %v1290_v56, %v764_v14  ;;  %v309_v53 = vld [vmem:[#allocation2 + $0xc8] sm:$0xff] }
  0xf6   : > { %v778_v27 = vmul.f32 %v1285_v46, %v739_v22  ;;  %708 = vst.msk [vmem:[#allocation2 + $0xa8] sm:$0xff] %vm251_vm0, %v675_v17  ;;  %v850_v30 = vmax.f32 %v818_v18, 0.0  ;;  %v832_v31 = vmax.f32 %v800_v19, 0.0  ;;  %v819_v32 = vadd.f32 %v1290_v56, %v780_v20  ;;  %v1059_v34 = vpop.f32.mrb[8].mxu0  ;;  %v298_v17 = vld [vmem:[#allocation2 + $0x70] sm:$0xff] }
  0xf7   : > { %v801_v33 = vadd.f32 %v1290_v56, %v762_v21  ;;  %866 = vst.msk [vmem:[%s1307_s9 + $0x10] sm:$0xff] %vm251_vm0, %v834_v24  ;;  %v848_v37 = vmax.f32 %v816_v25, 0.0  ;;  %v835_v38 = vmax.f32 %v803_v26, 0.0  ;;  %v664_v40 = vadd.f32 %v1059_v34, %v294_v23  ;;  %v1075_v41 = vpop.f32.mrb[8].mxu1  ;;  %v559_v42 = vpop.f32.mrb[9].mxu0  ;;  %v314_v22 = vld [vmem:[#allocation2 + $0xf0] sm:$0xff] }
  0xf8   : > { %v817_v39 = vadd.f32 %v1290_v56, %v778_v27  ;;  %882 = vst.msk [vmem:[%s1307_s9 + $0x90] sm:$0xff] %vm251_vm0, %v850_v30  ;;  %864 = vst.msk [vmem:[%s1307_s9] sm:$0xff] %vm251_vm0, %v832_v31  ;;  %v851_v45 = vmax.f32 %v819_v32, 0.0  ;;  %v728_v48 = vld [vmem:[#allocation2 + $0x30] sm:$0xff]  ;;  %v680_v49 = vadd.f32 %v1075_v41, %v310_v28  ;;  %v662_v50 = vadd.f32 %v559_v42, %v292_v29  ;;  %v623_v51 = vpop.f32.mrb[9].mxu1  ;;  %v1060_v52 = vpop.f32.mrb[10].mxu0 }
  0xf9   : > { %v833_v47 = vmax.f32 %v801_v33, 0.0  ;;  %880 = vst.msk [vmem:[%s1307_s9 + $0x80] sm:$0xff] %vm251_vm0, %v848_v37  ;;  %867 = vst.msk [vmem:[%s1307_s9 + $0x18] sm:$0xff] %vm251_vm0, %v835_v38  ;;  %v767_v55 = vmul.f32 %v1285_v46, %v728_v48  ;;  %v744_v57 = vld [vmem:[#allocation2 + $0xb0] sm:$0xff]  ;;  %v726_v58 = vld [vmem:[#allocation2 + $0x20] sm:$0xff]  ;;  %v678_v59 = vadd.f32 %v623_v51, %v308_v35  ;;  %v665_v60 = vadd.f32 %v1060_v52, %v295_v36  ;;  %v1076_v61 = vpop.f32.mrb[10].mxu1 }
  0xfa   : > { %v849_v54 = vmax.f32 %v817_v39, 0.0  ;;  %697 = vst.msk [vmem:[#allocation2 + $0x50] sm:$0xff] %vm251_vm0, %v664_v40  ;;  %v562_v62 = vpop.f32.mrb[11].mxu0  ;;  %883 = vst.msk [vmem:[%s1307_s9 + $0x98] sm:$0xff] %vm251_vm0, %v851_v45  ;;  %v783_v63 = vmul.f32 %v1285_v46, %v744_v57  ;;  %v765_v0 = vmul.f32 %v1285_v46, %v726_v58  ;;  %v742_v1 = vld [vmem:[#allocation2 + $0xa0] sm:$0xff]  ;;  %v681_v3 = vadd.f32 %v1076_v61, %v311_v43  ;;  %v626_v5 = vpop.f32.mrb[11].mxu1 }
  0xfb   : > { %865 = vst.msk [vmem:[%s1307_s9 + $0x8] sm:$0xff] %vm251_vm0, %v833_v47  ;;  %v729_v2 = vld [vmem:[#allocation2 + $0x38] sm:$0xff]  ;;  %713 = vst.msk [vmem:[#allocation2 + $0xd0] sm:$0xff] %vm251_vm0, %v680_v49  ;;  %v663_v4 = vadd.f32 %v562_v62, %v293_v44  ;;  %v806_v6 = vadd.f32 %v1290_v56, %v767_v55  ;;  %v781_v7 = vmul.f32 %v1285_v46, %v742_v1  ;;  %v296_v23 = vld [vmem:[#allocation2 + $0x60] sm:$0xff] }
  0xfc   : > { %695 = vst.msk [vmem:[#allocation2 + $0x40] sm:$0xff] %vm251_vm0, %v662_v50  ;;  %881 = vst.msk [vmem:[%s1307_s9 + $0x88] sm:$0xff] %vm251_vm0, %v849_v54  ;;  %v768_v8 = vmul.f32 %v1285_v46, %v729_v2  ;;  %v745_v9 = vld [vmem:[#allocation2 + $0xb8] sm:$0xff]  ;;  %v727_v10 = vld [vmem:[#allocation2 + $0x28] sm:$0xff]  ;;  %v679_v11 = vadd.f32 %v626_v5, %v309_v53  ;;  %v822_v12 = vadd.f32 %v1290_v56, %v783_v63 }
  0xfd   : > { %711 = vst.msk [vmem:[#allocation2 + $0xc0] sm:$0xff] %vm251_vm0, %v678_v59  ;;  %698 = vst.msk [vmem:[#allocation2 + $0x58] sm:$0xff] %vm251_vm0, %v665_v60  ;;  %v804_v13 = vadd.f32 %v1290_v56, %v765_v0  ;;  %v784_v14 = vmul.f32 %v1285_v46, %v745_v9  ;;  %v766_v15 = vmul.f32 %v1285_v46, %v727_v10  ;;  %v743_v16 = vld [vmem:[#allocation2 + $0xa8] sm:$0xff]  ;;  %v838_v18 = vmax.f32 %v806_v6, 0.0  ;;  %v312_v29 = vld [vmem:[#allocation2 + $0xe0] sm:$0xff] }
  0xfe   : > { %714 = vst.msk [vmem:[#allocation2 + $0xd8] sm:$0xff] %vm251_vm0, %v681_v3  ;;  %696 = vst.msk [vmem:[#allocation2 + $0x48] sm:$0xff] %vm251_vm0, %v663_v4  ;;  %v820_v19 = vadd.f32 %v1290_v56, %v781_v7  ;;  %v807_v20 = vadd.f32 %v1290_v56, %v768_v8  ;;  %v782_v21 = vmul.f32 %v1285_v46, %v743_v16  ;;  %v854_v24 = vmax.f32 %v822_v12, 0.0  ;;  %v1063_v28 = vpop.f32.mrb[12].mxu0  ;;  %v299_v30 = vld [vmem:[#allocation2 + $0x78] sm:$0xff]  ;;  %v297_v38 = vld [vmem:[#allocation2 + $0x68] sm:$0xff] }
  0xff   : > { %712 = vst.msk [vmem:[#allocation2 + $0xc8] sm:$0xff] %vm251_vm0, %v679_v11  ;;  %v836_v25 = vmax.f32 %v804_v13, 0.0  ;;  %v823_v26 = vadd.f32 %v1290_v56, %v784_v14  ;;  %v805_v27 = vadd.f32 %v1290_v56, %v766_v15  ;;  %870 = vst.msk [vmem:[%s1307_s9 + $0x30] sm:$0xff] %vm251_vm0, %v838_v18  ;;  %v668_v34 = vadd.f32 %v1063_v28, %v298_v17  ;;  %v1079_v35 = vpop.f32.mrb[12].mxu1  ;;  %v575_v36 = vpop.f32.mrb[13].mxu0  ;;  %v315_v37 = vld [vmem:[#allocation2 + $0xf8] sm:$0xff] }
 0x100   : > { %v852_v31 = vmax.f32 %v820_v19, 0.0  ;;  %v839_v32 = vmax.f32 %v807_v20, 0.0  ;;  %v821_v33 = vadd.f32 %v1290_v56, %v782_v21  ;;  %886 = vst.msk [vmem:[%s1307_s9 + $0xb0] sm:$0xff] %vm251_vm0, %v854_v24  ;;  %v684_v42 = vadd.f32 %v1079_v35, %v314_v22  ;;  %v639_v44 = vpop.f32.mrb[13].mxu1  ;;  %v1064_v45 = vpop.f32.mrb[14].mxu0  ;;  %v313_v47 = vld [vmem:[#allocation2 + $0xe8] sm:$0xff] }
 0x101   : > { %868 = vst.msk [vmem:[%s1307_s9 + $0x20] sm:$0xff] %vm251_vm0, %v836_v25  ;;  %v855_v39 = vmax.f32 %v823_v26, 0.0  ;;  %v837_v40 = vmax.f32 %v805_v27, 0.0  ;;  %v732_v41 = vld [vmem:[#allocation2 + $0x50] sm:$0xff]  ;;  %v666_v43 = vadd.f32 %v575_v36, %v296_v23  ;;  %701 = vst.msk [vmem:[#allocation2 + $0x70] sm:$0xff] %vm251_vm0, %v668_v34  ;;  %v682_v52 = vadd.f32 %v639_v44, %v312_v29  ;;  %v1080_v54 = vpop.f32.mrb[14].mxu1 }
 0x102   : > { %884 = vst.msk [vmem:[%s1307_s9 + $0xa0] sm:$0xff] %vm251_vm0, %v852_v31  ;;  %871 = vst.msk [vmem:[%s1307_s9 + $0x38] sm:$0xff] %vm251_vm0, %v839_v32  ;;  %v853_v48 = vmax.f32 %v821_v33, 0.0  ;;  %v771_v49 = vmul.f32 %v1285_v46, %v732_v41  ;;  %v748_v50 = vld [vmem:[#allocation2 + $0xd0] sm:$0xff]  ;;  %v669_v53 = vadd.f32 %v1064_v45, %v299_v30  ;;  %v578_v55 = vpop.f32.mrb[15].mxu0  ;;  %v685_v61 = vadd.f32 %v1080_v54, %v315_v37  ;;  %v642_v63 = vpop.f32.mrb[15].mxu1 }
 0x103   : > { %v730_v51 = vld [vmem:[#allocation2 + $0x40] sm:$0xff]  ;;  %887 = vst.msk [vmem:[%s1307_s9 + $0xb8] sm:$0xff] %vm251_vm0, %v855_v39  ;;  %869 = vst.msk [vmem:[%s1307_s9 + $0x28] sm:$0xff] %vm251_vm0, %v837_v40  ;;  %v787_v57 = vmul.f32 %v1285_v46, %v748_v50  ;;  %v667_v62 = vadd.f32 %v578_v55, %v297_v38  ;;  %v683_v5 = vadd.f32 %v642_v63, %v313_v47 }
 0x104   : > { %v769_v58 = vmul.f32 %v1285_v46, %v730_v51  ;;  %v746_v59 = vld [vmem:[#allocation2 + $0xc0] sm:$0xff]  ;;  %v733_v60 = vld [vmem:[#allocation2 + $0x58] sm:$0xff]  ;;  %717 = vst.msk [vmem:[#allocation2 + $0xf0] sm:$0xff] %vm251_vm0, %v684_v42  ;;  %699 = vst.msk [vmem:[#allocation2 + $0x60] sm:$0xff] %vm251_vm0, %v666_v43  ;;  %v810_v0 = vadd.f32 %v1290_v56, %v771_v49 }
 0x105   : > { %885 = vst.msk [vmem:[%s1307_s9 + $0xa8] sm:$0xff] %vm251_vm0, %v853_v48  ;;  %v785_v1 = vmul.f32 %v1285_v46, %v746_v59  ;;  %v772_v2 = vmul.f32 %v1285_v46, %v733_v60  ;;  %v749_v3 = vld [vmem:[#allocation2 + $0xd8] sm:$0xff]  ;;  %v731_v4 = vld [vmem:[#allocation2 + $0x48] sm:$0xff]  ;;  %715 = vst.msk [vmem:[#allocation2 + $0xe0] sm:$0xff] %vm251_vm0, %v682_v52  ;;  %v826_v6 = vadd.f32 %v1290_v56, %v787_v57 }
 0x106   : > { %702 = vst.msk [vmem:[#allocation2 + $0x78] sm:$0xff] %vm251_vm0, %v669_v53  ;;  %v808_v7 = vadd.f32 %v1290_v56, %v769_v58  ;;  %v788_v8 = vmul.f32 %v1285_v46, %v749_v3  ;;  %v770_v9 = vmul.f32 %v1285_v46, %v731_v4  ;;  %v747_v10 = vld [vmem:[#allocation2 + $0xc8] sm:$0xff]  ;;  %718 = vst.msk [vmem:[#allocation2 + $0xf8] sm:$0xff] %vm251_vm0, %v685_v61  ;;  %v842_v11 = vmax.f32 %v810_v0, 0.0 }
 0x107   : > { %700 = vst.msk [vmem:[#allocation2 + $0x68] sm:$0xff] %vm251_vm0, %v667_v62  ;;  %v824_v12 = vadd.f32 %v1290_v56, %v785_v1  ;;  %v811_v13 = vadd.f32 %v1290_v56, %v772_v2  ;;  %v786_v14 = vmul.f32 %v1285_v46, %v747_v10  ;;  %716 = vst.msk [vmem:[#allocation2 + $0xe8] sm:$0xff] %vm251_vm0, %v683_v5  ;;  %v858_v15 = vmax.f32 %v826_v6, 0.0 }
 0x108   : > { %v840_v16 = vmax.f32 %v808_v7, 0.0  ;;  %v827_v17 = vadd.f32 %v1290_v56, %v788_v8  ;;  %v809_v18 = vadd.f32 %v1290_v56, %v770_v9  ;;  %874 = vst.msk [vmem:[%s1307_s9 + $0x50] sm:$0xff] %vm251_vm0, %v842_v11  ;;  %v736_v24 = vld [vmem:[#allocation2 + $0x70] sm:$0xff] }
 0x109   : > { %v856_v19 = vmax.f32 %v824_v12, 0.0  ;;  %v843_v20 = vmax.f32 %v811_v13, 0.0  ;;  %v825_v21 = vadd.f32 %v1290_v56, %v786_v14  ;;  %890 = vst.msk [vmem:[%s1307_s9 + $0xd0] sm:$0xff] %vm251_vm0, %v858_v15  ;;  %v775_v26 = vmul.f32 %v1285_v46, %v736_v24 }
 0x10a   : > { %872 = vst.msk [vmem:[%s1307_s9 + $0x40] sm:$0xff] %vm251_vm0, %v840_v16  ;;  %v859_v22 = vmax.f32 %v827_v17, 0.0  ;;  %v841_v23 = vmax.f32 %v809_v18, 0.0 }
 0x10b   : > { %888 = vst.msk [vmem:[%s1307_s9 + $0xc0] sm:$0xff] %vm251_vm0, %v856_v19  ;;  %875 = vst.msk [vmem:[%s1307_s9 + $0x58] sm:$0xff] %vm251_vm0, %v843_v20  ;;  %v857_v25 = vmax.f32 %v825_v21, 0.0  ;;  %v752_v27 = vld [vmem:[#allocation2 + $0xf0] sm:$0xff]  ;;  %v734_v28 = vld [vmem:[#allocation2 + $0x60] sm:$0xff]  ;;  %v814_v33 = vadd.f32 %v1290_v56, %v775_v26 }
 0x10c   : > { %891 = vst.msk [vmem:[%s1307_s9 + $0xd8] sm:$0xff] %vm251_vm0, %v859_v22  ;;  %873 = vst.msk [vmem:[%s1307_s9 + $0x48] sm:$0xff] %vm251_vm0, %v841_v23  ;;  %v791_v29 = vmul.f32 %v1285_v46, %v752_v27  ;;  %v773_v30 = vmul.f32 %v1285_v46, %v734_v28  ;;  %v750_v31 = vld [vmem:[#allocation2 + $0xe0] sm:$0xff] }
 0x10d   : > { %v737_v32 = vld [vmem:[#allocation2 + $0x78] sm:$0xff]  ;;  %889 = vst.msk [vmem:[%s1307_s9 + $0xc8] sm:$0xff] %vm251_vm0, %v857_v25  ;;  %v789_v34 = vmul.f32 %v1285_v46, %v750_v31  ;;  %v846_v43 = vmax.f32 %v814_v33, 0.0 }
 0x10e   : > { %v776_v35 = vmul.f32 %v1285_v46, %v737_v32  ;;  %v753_v36 = vld [vmem:[#allocation2 + $0xf8] sm:$0xff]  ;;  %v735_v37 = vld [vmem:[#allocation2 + $0x68] sm:$0xff]  ;;  %v830_v38 = vadd.f32 %v1290_v56, %v791_v29  ;;  %v812_v39 = vadd.f32 %v1290_v56, %v773_v30 }
 0x10f   : > { %v792_v40 = vmul.f32 %v1285_v46, %v753_v36  ;;  %v774_v41 = vmul.f32 %v1285_v46, %v735_v37  ;;  %v751_v42 = vld [vmem:[#allocation2 + $0xe8] sm:$0xff]  ;;  %v828_v44 = vadd.f32 %v1290_v56, %v789_v34  ;;  %878 = vst.msk [vmem:[%s1307_s9 + $0x70] sm:$0xff] %vm251_vm0, %v846_v43 }
 0x110   : > { %v815_v45 = vadd.f32 %v1290_v56, %v776_v35  ;;  %v790_v47 = vmul.f32 %v1285_v46, %v751_v42  ;;  %v862_v48 = vmax.f32 %v830_v38, 0.0  ;;  %v844_v49 = vmax.f32 %v812_v39, 0.0 }
 0x111   : > { %v831_v50 = vadd.f32 %v1290_v56, %v792_v40  ;;  %v813_v51 = vadd.f32 %v1290_v56, %v774_v41  ;;  %v860_v52 = vmax.f32 %v828_v44, 0.0 }
 0x112   : > { %v847_v53 = vmax.f32 %v815_v45, 0.0  ;;  %v829_v54 = vadd.f32 %v1290_v56, %v790_v47  ;;  %894 = vst.msk [vmem:[%s1307_s9 + $0xf0] sm:$0xff] %vm251_vm0, %v862_v48  ;;  %876 = vst.msk [vmem:[%s1307_s9 + $0x60] sm:$0xff] %vm251_vm0, %v844_v49 }
 0x113   : > { %v863_v46 = vmax.f32 %v831_v50, 0.0  ;;  %v845_v55 = vmax.f32 %v813_v51, 0.0  ;;  %892 = vst.msk [vmem:[%s1307_s9 + $0xe0] sm:$0xff] %vm251_vm0, %v860_v52 }
 0x114   : > { %879 = vst.msk [vmem:[%s1307_s9 + $0x78] sm:$0xff] %vm251_vm0, %v847_v53  ;;  %v861_v57 = vmax.f32 %v829_v54, 0.0 }
 0x115   : > { %895 = vst.msk [vmem:[%s1307_s9 + $0xf8] sm:$0xff] %vm251_vm0, %v863_v46  ;;  %877 = vst.msk [vmem:[%s1307_s9 + $0x68] sm:$0xff] %vm251_vm0, %v845_v55 }
 0x116   : > { %893 = vst.msk [vmem:[%s1307_s9 + $0xe8] sm:$0xff] %vm251_vm0, %v861_v57 }
 0x117 PF: > { %s14_s17 = sadd.s32 1, %s1150_s17   ;;  %s1464_s15 = smov %s1146_s16 }
 0x118   : > { %p11_p5 = scmp.ge.s32.totalorder %s14_s17, 4   ;;  %s1465_s16 = smov %s1467_s18 }
 0x11a   :  { %13 = sbr.rel (!%p11_p5) target bundleno = 2 (0x2), region = 77 }

// kernel: complex_block_forward.6
= control target key start
LH: loop header
LB: loop body
LE: loop exit
PB: predicated region body
PF: predicated region fallthrough
CT: control target
= control target key end

     0   :  { %vm22_vm0 = vcmask 130048   ;;  %v558_v0 = vmov 0   ;;  %v559_v2 = vmov 0.0   ;;  %s824_s1 = inlined_call_operand.vmem [shape: bf16[144,16], index: 1, kind: input, shape index: {}]   ;;  %s825_s0 = inlined_call_operand.vmem [shape: bf16[128,144], index: 0, kind: input, shape index: {}]   ;;  %s826_s2 = inlined_call_operand.vmem [shape: f32[1,16], index: 2, kind: input, shape index: {}]   ;;  %s827_s3 = inlined_call_operand.vmem [shape: f32[1,16], index: 3, kind: input, shape index: {}]   ;;  %s828_s4 = inlined_call_operand.vmem [shape: f32[128,16], index: 4, kind: output, shape index: {}]  }
   0x1   :  { %240 = vmatprep.subr.bf16.mxu0 %v558_v0  ;;  %505 = vmatprep.subr.bf16.mxu1 %v558_v0  ;;  %v525_v1 = vld [vmem:[%s824_s1] sm:$0xff]   ;;  %23 = vst.msk [vmem:[#allocation2] sm:$0xff] %vm22_vm0, %v559_v2  ;;  %24 = vst.msk [vmem:[#allocation2 + $0x8] sm:$0xff] %vm22_vm0, %v559_v2  ;;  %v526_v3 = vld [vmem:[%s824_s1 + $0x8] sm:$0xff]  }
   0x2   :  { %25 = vst.msk [vmem:[#allocation2 + $0x10] sm:$0xff] %vm22_vm0, %v559_v2  ;;  %26 = vst.msk [vmem:[#allocation2 + $0x18] sm:$0xff] %vm22_vm0, %v559_v2  ;;  %241 = vmatpush1.bf16.msra.mxu0 %v525_v1  ;;  %514 = vmatpush1.bf16.msra.mxu1 %v525_v1  ;;  %v527_v4 = vld [vmem:[%s824_s1 + $0x10] sm:$0xff]   ;;  %v528_v5 = vld [vmem:[%s824_s1 + $0x18] sm:$0xff]  }
   0x3   :  { %27 = vst.msk [vmem:[#allocation2 + $0x20] sm:$0xff] %vm22_vm0, %v559_v2  ;;  %28 = vst.msk [vmem:[#allocation2 + $0x28] sm:$0xff] %vm22_vm0, %v559_v2  ;;  %242 = vmatprep.subr.bf16.mxu0 %v558_v0  ;;  %506 = vmatprep.subr.bf16.mxu1 %v558_v0  ;;  %v536_v6 = vld [vmem:[%s825_s0 + $0x4] ss:$8 sps:$4 sm:$0xff]   ;;  %v531_v10 = vld [vmem:[%s824_s1 + $0x30] sm:$0xff]  }
   0x4   :  { %29 = vst.msk [vmem:[#allocation2 + $0x30] sm:$0xff] %vm22_vm0, %v559_v2  ;;  %30 = vst.msk [vmem:[#allocation2 + $0x38] sm:$0xff] %vm22_vm0, %v559_v2  ;;  %v539_v7 = vld [vmem:[%s825_s0 + $0x44] ss:$8 sps:$4 sm:$0xff]   ;;  %495 = vmatprep.mubr.msk.bf16.mxu0 %vm22_vm0, %v536_v6  ;;  %v532_v11 = vld [vmem:[%s824_s1 + $0x38] sm:$0xff]  }
   0x5   :  { %31 = vst.msk [vmem:[#allocation2 + $0x40] sm:$0xff] %vm22_vm0, %v559_v2  ;;  %32 = vst.msk [vmem:[#allocation2 + $0x48] sm:$0xff] %vm22_vm0, %v559_v2  ;;  %499 = vmatprep.mubr.msk.bf16.mxu1 %vm22_vm0, %v539_v7  ;;  %v529_v8 = vld [vmem:[%s824_s1 + $0x20] sm:$0xff]   ;;  %v530_v9 = vld [vmem:[%s824_s1 + $0x28] sm:$0xff]  }
   0x6   :  { %33 = vst.msk [vmem:[#allocation2 + $0x50] sm:$0xff] %vm22_vm0, %v559_v2  ;;  %34 = vst.msk [vmem:[#allocation2 + $0x58] sm:$0xff] %vm22_vm0, %v559_v2  ;;  %243 = vmatpush1.bf16.msra.mxu0 %v526_v3  ;;  %515 = vmatpush1.bf16.msra.mxu1 %v526_v3  ;;  %v533_v12 = vld [vmem:[%s824_s1 + $0x40] sm:$0xff]   ;;  %v540_v15 = vld [vmem:[%s825_s0 + $0x14] ss:$8 sps:$4 sm:$0xff]  }
   0x7   :  { %35 = vst.msk [vmem:[#allocation2 + $0x60] sm:$0xff] %vm22_vm0, %v559_v2  ;;  %36 = vst.msk [vmem:[#allocation2 + $0x68] sm:$0xff] %vm22_vm0, %v559_v2  ;;  %244 = vmatprep.subr.bf16.mxu0 %v558_v0  ;;  %507 = vmatprep.subr.bf16.mxu1 %v558_v0  ;;  %v534_v13 = vld [vmem:[%s825_s0] ss:$8 sps:$4 sm:$0xff]   ;;  %v542_v16 = vld [vmem:[%s825_s0 + $0x54] ss:$8 sps:$4 sm:$0xff]  }
   0x8   :  { %37 = vst.msk [vmem:[#allocation2 + $0x70] sm:$0xff] %vm22_vm0, %v559_v2  ;;  %38 = vst.msk [vmem:[#allocation2 + $0x78] sm:$0xff] %vm22_vm0, %v559_v2  ;;  %v537_v14 = vld [vmem:[%s825_s0 + $0x40] ss:$8 sps:$4 sm:$0xff]   ;;  %v544_v17 = vld [vmem:[%s825_s0 + $0x10] ss:$8 sps:$4 sm:$0xff]  }
   0x9   :  { %v545_v18 = vld [vmem:[%s825_s0 + $0x50] ss:$8 sps:$4 sm:$0xff]   ;;  %v546_v19 = vld [vmem:[%s825_s0 + $0x24] ss:$8 sps:$4 sm:$0xff]   ;;  %v550_v21 = vld [vmem:[%s825_s0 + $0x20] ss:$8 sps:$4 sm:$0xff]  }
   0xa   :  { %245 = vmatpush1.bf16.msra.mxu0 %v527_v4  ;;  %516 = vmatpush1.bf16.msra.mxu1 %v527_v4  ;;  %v548_v20 = vld [vmem:[%s825_s0 + $0x64] ss:$8 sps:$4 sm:$0xff]   ;;  %v551_v22 = vld [vmem:[%s825_s0 + $0x60] ss:$8 sps:$4 sm:$0xff]   ;;  %v552_v23 = vld [vmem:[%s825_s0 + $0x34] ss:$8 sps:$4 sm:$0xff]  }
   0xb   :  { %246 = vmatprep.subr.bf16.mxu0 %v558_v0  ;;  %508 = vmatprep.subr.bf16.mxu1 %v558_v0  ;;  %v554_v24 = vld [vmem:[%s825_s0 + $0x74] ss:$8 sps:$4 sm:$0xff]   ;;  %v556_v25 = vld [vmem:[%s825_s0 + $0x30] ss:$8 sps:$4 sm:$0xff]   ;;  %v39_v27 = vld [vmem:[#allocation2] sm:$0xff] }
   0xc   :  { %v557_v26 = vld [vmem:[%s825_s0 + $0x70] ss:$8 sps:$4 sm:$0xff]   ;;  %v47_v28 = vld [vmem:[#allocation2 + $0x40] sm:$0xff]  ;;  %v40_v31 = vld [vmem:[#allocation2 + $0x8] sm:$0xff] }
   0xd   :  { %v48_v32 = vld [vmem:[#allocation2 + $0x48] sm:$0xff]  ;;  %v41_v43 = vld [vmem:[#allocation2 + $0x10] sm:$0xff]  ;;  %v709_v45 = vld [vmem:[%s826_s2] ss:$0 sm:$0xff] }
   0xe   :  { %247 = vmatpush1.bf16.msra.mxu0 %v528_v5  ;;  %517 = vmatpush1.bf16.msra.mxu1 %v528_v5  ;;  %v49_v44 = vld [vmem:[#allocation2 + $0x50] sm:$0xff]  ;;  %v42_v48 = vld [vmem:[#allocation2 + $0x18] sm:$0xff]  ;;  %v714_v55 = vld [vmem:[%s827_s3] ss:$0 sm:$0xff] }
   0xf   :  { %248 = vmatprep.subr.bf16.mxu0 %v558_v0  ;;  %509 = vmatprep.subr.bf16.mxu1 %v558_v0  ;;  %v50_v49 = vld [vmem:[#allocation2 + $0x58] sm:$0xff]  ;;  %v43_v7 = vld [vmem:[#allocation2 + $0x20] sm:$0xff] }
  0x12   :  { %249 = vmatpush1.bf16.msra.mxu0 %v529_v8  ;;  %518 = vmatpush1.bf16.msra.mxu1 %v529_v8  ;;  %v51_v8 = vld [vmem:[#allocation2 + $0x60] sm:$0xff] }
  0x13   :  { %250 = vmatprep.subr.bf16.mxu0 %v558_v0  ;;  %510 = vmatprep.subr.bf16.mxu1 %v558_v0 }
  0x16   :  { %251 = vmatpush1.bf16.msra.mxu0 %v530_v9  ;;  %519 = vmatpush1.bf16.msra.mxu1 %v530_v9 }
  0x17   :  { %252 = vmatprep.subr.bf16.mxu0 %v558_v0  ;;  %511 = vmatprep.subr.bf16.mxu1 %v558_v0 }
  0x1a   :  { %253 = vmatpush1.bf16.msra.mxu0 %v531_v10  ;;  %520 = vmatpush1.bf16.msra.mxu1 %v531_v10 }
  0x1b   :  { %254 = vmatprep.subr.bf16.mxu0 %v558_v0  ;;  %512 = vmatprep.subr.bf16.mxu1 %v558_v0 }
  0x1e   :  { %255 = vmatpush1.bf16.msra.mxu0 %v532_v11  ;;  %521 = vmatpush1.bf16.msra.mxu1 %v532_v11 }
  0x1f   :  { %256 = vmatprep.subr.bf16.mxu0 %v558_v0  ;;  %513 = vmatprep.subr.bf16.mxu1 %v558_v0 }
  0x22   :  { %257 = vmatpush1.bf16.msra.mxu0 %v533_v12  ;;  %522 = vmatpush1.bf16.msra.mxu1 %v533_v12 }
  0x25   :  { %273 = vmatmul.mubr.bf16.vlgmr.msra.gmra.mrb[0].mxu0 %v534_v13  ;;  %305 = vmatmul.mubr.bf16.vlgmr.msra.gmra.mrb[0].mxu1 %v537_v14 }
  0x26   :  { %496 = vmatprep.mubr.msk.bf16.mxu0 %vm22_vm0, %v540_v15  ;;  %500 = vmatprep.mubr.msk.bf16.mxu1 %vm22_vm0, %v542_v16  ;;  %v44_v15 = vld [vmem:[#allocation2 + $0x28] sm:$0xff] }
  0x27   :  { %v52_v16 = vld [vmem:[#allocation2 + $0x68] sm:$0xff] }
  0x2d   :  { %281 = vmatmul.mubr.bf16.gmra.mrb[4].mxu0 %v544_v17  ;;  %313 = vmatmul.mubr.bf16.gmra.mrb[4].mxu1 %v545_v18 }
  0x2e   :  { %497 = vmatprep.mubr.msk.bf16.mxu0 %vm22_vm0, %v546_v19  ;;  %501 = vmatprep.mubr.msk.bf16.mxu1 %vm22_vm0, %v548_v20 }
  0x35   :  { %289 = vmatmul.mubr.bf16.gmra.mrb[8].mxu0 %v550_v21  ;;  %321 = vmatmul.mubr.bf16.gmra.mrb[8].mxu1 %v551_v22 }
  0x36   :  { %498 = vmatprep.mubr.msk.bf16.mxu0 %vm22_vm0, %v552_v23  ;;  %502 = vmatprep.mubr.msk.bf16.mxu1 %vm22_vm0, %v554_v24 }
  0x3d   :  { %297 = vmatmul.mubr.bf16.gmra.mrb[12].mxu0 %v556_v25  ;;  %329 = vmatmul.mubr.bf16.gmra.mrb[12].mxu1 %v557_v26 }
  0xf8   :  { %v274_v29 = vpop.f32.mrb[0].mxu0  ;;  %v306_v30 = vpop.f32.mrb[0].mxu1 }
  0xf9   :  { %v337_v33 = vadd.f32 %v274_v29, %v39_v27  ;;  %v345_v34 = vadd.f32 %v306_v30, %v47_v28  ;;  %v276_v35 = vpop.f32.mrb[1].mxu0  ;;  %v308_v36 = vpop.f32.mrb[1].mxu1 }
  0xfa   :  { %v277_v37 = vpop.f32.mrb[2].mxu0  ;;  %v309_v38 = vpop.f32.mrb[2].mxu1 }
  0xfb   :  { %353 = vst.msk [vmem:[#allocation2] sm:$0xff] %vm22_vm0, %v337_v33  ;;  %361 = vst.msk [vmem:[#allocation2 + $0x40] sm:$0xff] %vm22_vm0, %v345_v34  ;;  %v338_v39 = vadd.f32 %v277_v37, %v40_v31  ;;  %v346_v40 = vadd.f32 %v309_v38, %v48_v32  ;;  %v279_v41 = vpop.f32.mrb[3].mxu0  ;;  %v311_v42 = vpop.f32.mrb[3].mxu1 }
  0xfd   :  { %354 = vst.msk [vmem:[#allocation2 + $0x8] sm:$0xff] %vm22_vm0, %v338_v39  ;;  %362 = vst.msk [vmem:[#allocation2 + $0x48] sm:$0xff] %vm22_vm0, %v346_v40  ;;  %v45_v39 = vld [vmem:[#allocation2 + $0x30] sm:$0xff] }
  0xfe   :  { %v53_v40 = vld [vmem:[#allocation2 + $0x70] sm:$0xff] }
 0x100   :  { %v282_v46 = vpop.f32.mrb[4].mxu0  ;;  %v314_v47 = vpop.f32.mrb[4].mxu1 }
 0x101   :  { %v339_v50 = vadd.f32 %v282_v46, %v41_v43  ;;  %v347_v51 = vadd.f32 %v314_v47, %v49_v44  ;;  %v284_v52 = vpop.f32.mrb[5].mxu0  ;;  %v316_v53 = vpop.f32.mrb[5].mxu1 }
 0x102   :  { %v372_v54 = vld [vmem:[#allocation2] sm:$0xff]  ;;  %v285_v57 = vpop.f32.mrb[6].mxu0  ;;  %v317_v58 = vpop.f32.mrb[6].mxu1 }
 0x103   :  { %v380_v56 = vld [vmem:[#allocation2 + $0x40] sm:$0xff]  ;;  %v395_v59 = vmul.f32 %v709_v45, %v372_v54  ;;  %355 = vst.msk [vmem:[#allocation2 + $0x10] sm:$0xff] %vm22_vm0, %v339_v50  ;;  %363 = vst.msk [vmem:[#allocation2 + $0x50] sm:$0xff] %vm22_vm0, %v347_v51  ;;  %v340_v61 = vadd.f32 %v285_v57, %v42_v48  ;;  %v348_v62 = vadd.f32 %v317_v58, %v50_v49  ;;  %v287_v63 = vpop.f32.mrb[7].mxu0  ;;  %v319_v0 = vpop.f32.mrb[7].mxu1  ;;  %v46_v48 = vld [vmem:[#allocation2 + $0x38] sm:$0xff] }
 0x104   :  { %v403_v60 = vmul.f32 %v709_v45, %v380_v56  ;;  %v373_v1 = vld [vmem:[#allocation2 + $0x8] sm:$0xff]  ;;  %v54_v49 = vld [vmem:[#allocation2 + $0x78] sm:$0xff] }
 0x105   :  { %v381_v2 = vld [vmem:[#allocation2 + $0x48] sm:$0xff]  ;;  %v418_v3 = vadd.f32 %v714_v55, %v395_v59  ;;  %v396_v5 = vmul.f32 %v709_v45, %v373_v1  ;;  %356 = vst.msk [vmem:[#allocation2 + $0x18] sm:$0xff] %vm22_vm0, %v340_v61  ;;  %364 = vst.msk [vmem:[#allocation2 + $0x58] sm:$0xff] %vm22_vm0, %v348_v62 }
 0x106   :  { %v426_v4 = vadd.f32 %v714_v55, %v403_v60  ;;  %v404_v6 = vmul.f32 %v709_v45, %v381_v2 }
 0x107   :  { %v434_v9 = vmax.f32 %v418_v3, 0.0  ;;  %v419_v11 = vadd.f32 %v714_v55, %v396_v5 }
 0x108   :  { %v442_v10 = vmax.f32 %v426_v4, 0.0  ;;  %v427_v12 = vadd.f32 %v714_v55, %v404_v6  ;;  %v290_v13 = vpop.f32.mrb[8].mxu0  ;;  %v322_v14 = vpop.f32.mrb[8].mxu1 }
 0x109   :  { %450 = vst.msk [vmem:[%s828_s4] sm:$0xff] %vm22_vm0, %v434_v9  ;;  %v435_v17 = vmax.f32 %v419_v11, 0.0  ;;  %v341_v19 = vadd.f32 %v290_v13, %v43_v7  ;;  %v349_v20 = vadd.f32 %v322_v14, %v51_v8  ;;  %v292_v21 = vpop.f32.mrb[9].mxu0  ;;  %v324_v22 = vpop.f32.mrb[9].mxu1 }
 0x10a   :  { %458 = vst.msk [vmem:[%s828_s4 + $0x40] sm:$0xff] %vm22_vm0, %v442_v10  ;;  %v443_v18 = vmax.f32 %v427_v12, 0.0  ;;  %v374_v23 = vld [vmem:[#allocation2 + $0x10] sm:$0xff]  ;;  %v293_v25 = vpop.f32.mrb[10].mxu0  ;;  %v325_v26 = vpop.f32.mrb[10].mxu1 }
 0x10b   :  { %v382_v24 = vld [vmem:[#allocation2 + $0x50] sm:$0xff]  ;;  %451 = vst.msk [vmem:[%s828_s4 + $0x8] sm:$0xff] %vm22_vm0, %v435_v17  ;;  %v397_v27 = vmul.f32 %v709_v45, %v374_v23  ;;  %357 = vst.msk [vmem:[#allocation2 + $0x20] sm:$0xff] %vm22_vm0, %v341_v19  ;;  %v342_v29 = vadd.f32 %v293_v25, %v44_v15  ;;  %v350_v30 = vadd.f32 %v325_v26, %v52_v16  ;;  %v295_v31 = vpop.f32.mrb[11].mxu0  ;;  %v327_v32 = vpop.f32.mrb[11].mxu1 }
 0x10c   :  { %459 = vst.msk [vmem:[%s828_s4 + $0x48] sm:$0xff] %vm22_vm0, %v443_v18  ;;  %v405_v28 = vmul.f32 %v709_v45, %v382_v24  ;;  %365 = vst.msk [vmem:[#allocation2 + $0x60] sm:$0xff] %vm22_vm0, %v349_v20  ;;  %v375_v33 = vld [vmem:[#allocation2 + $0x18] sm:$0xff] }
 0x10d   :  { %v383_v34 = vld [vmem:[#allocation2 + $0x58] sm:$0xff]  ;;  %v420_v35 = vadd.f32 %v714_v55, %v397_v27  ;;  %v398_v37 = vmul.f32 %v709_v45, %v375_v33  ;;  %358 = vst.msk [vmem:[#allocation2 + $0x28] sm:$0xff] %vm22_vm0, %v342_v29  ;;  %366 = vst.msk [vmem:[#allocation2 + $0x68] sm:$0xff] %vm22_vm0, %v350_v30 }
 0x10e   :  { %v428_v36 = vadd.f32 %v714_v55, %v405_v28  ;;  %v406_v38 = vmul.f32 %v709_v45, %v383_v34 }
 0x10f   :  { %v436_v41 = vmax.f32 %v420_v35, 0.0  ;;  %v421_v43 = vadd.f32 %v714_v55, %v398_v37 }
 0x110   :  { %v444_v42 = vmax.f32 %v428_v36, 0.0  ;;  %v429_v44 = vadd.f32 %v714_v55, %v406_v38  ;;  %v298_v46 = vpop.f32.mrb[12].mxu0  ;;  %v330_v47 = vpop.f32.mrb[12].mxu1 }
 0x111   :  { %452 = vst.msk [vmem:[%s828_s4 + $0x10] sm:$0xff] %vm22_vm0, %v436_v41  ;;  %v437_v50 = vmax.f32 %v421_v43, 0.0  ;;  %v343_v52 = vadd.f32 %v298_v46, %v45_v39  ;;  %v351_v53 = vadd.f32 %v330_v47, %v53_v40  ;;  %v300_v54 = vpop.f32.mrb[13].mxu0  ;;  %v332_v56 = vpop.f32.mrb[13].mxu1 }
 0x112   :  { %460 = vst.msk [vmem:[%s828_s4 + $0x50] sm:$0xff] %vm22_vm0, %v444_v42  ;;  %v445_v51 = vmax.f32 %v429_v44, 0.0  ;;  %v376_v57 = vld [vmem:[#allocation2 + $0x20] sm:$0xff]  ;;  %v301_v59 = vpop.f32.mrb[14].mxu0  ;;  %v333_v60 = vpop.f32.mrb[14].mxu1 }
 0x113   :  { %v384_v58 = vld [vmem:[#allocation2 + $0x60] sm:$0xff]  ;;  %453 = vst.msk [vmem:[%s828_s4 + $0x18] sm:$0xff] %vm22_vm0, %v437_v50  ;;  %v399_v61 = vmul.f32 %v709_v45, %v376_v57  ;;  %359 = vst.msk [vmem:[#allocation2 + $0x30] sm:$0xff] %vm22_vm0, %v343_v52  ;;  %v344_v63 = vadd.f32 %v301_v59, %v46_v48  ;;  %v352_v0 = vadd.f32 %v333_v60, %v54_v49  ;;  %v303_v1 = vpop.f32.mrb[15].mxu0  ;;  %v335_v2 = vpop.f32.mrb[15].mxu1 }
 0x114   :  { %461 = vst.msk [vmem:[%s828_s4 + $0x58] sm:$0xff] %vm22_vm0, %v445_v51  ;;  %v407_v62 = vmul.f32 %v709_v45, %v384_v58  ;;  %367 = vst.msk [vmem:[#allocation2 + $0x70] sm:$0xff] %vm22_vm0, %v351_v53  ;;  %v377_v3 = vld [vmem:[#allocation2 + $0x28] sm:$0xff] }
 0x115   :  { %v385_v4 = vld [vmem:[#allocation2 + $0x68] sm:$0xff]  ;;  %v422_v5 = vadd.f32 %v714_v55, %v399_v61  ;;  %v400_v7 = vmul.f32 %v709_v45, %v377_v3  ;;  %360 = vst.msk [vmem:[#allocation2 + $0x38] sm:$0xff] %vm22_vm0, %v344_v63  ;;  %368 = vst.msk [vmem:[#allocation2 + $0x78] sm:$0xff] %vm22_vm0, %v352_v0 }
 0x116   :  { %v430_v6 = vadd.f32 %v714_v55, %v407_v62  ;;  %v408_v8 = vmul.f32 %v709_v45, %v385_v4 }
 0x117   :  { %v438_v9 = vmax.f32 %v422_v5, 0.0  ;;  %v423_v11 = vadd.f32 %v714_v55, %v400_v7 }
 0x118   :  { %v446_v10 = vmax.f32 %v430_v6, 0.0  ;;  %v431_v12 = vadd.f32 %v714_v55, %v408_v8 }
 0x119   :  { %454 = vst.msk [vmem:[%s828_s4 + $0x20] sm:$0xff] %vm22_vm0, %v438_v9  ;;  %v439_v13 = vmax.f32 %v423_v11, 0.0 }
 0x11a   :  { %462 = vst.msk [vmem:[%s828_s4 + $0x60] sm:$0xff] %vm22_vm0, %v446_v10  ;;  %v447_v14 = vmax.f32 %v431_v12, 0.0  ;;  %v378_v15 = vld [vmem:[#allocation2 + $0x30] sm:$0xff] }
 0x11b   :  { %v386_v16 = vld [vmem:[#allocation2 + $0x70] sm:$0xff]  ;;  %455 = vst.msk [vmem:[%s828_s4 + $0x28] sm:$0xff] %vm22_vm0, %v439_v13  ;;  %v401_v17 = vmul.f32 %v709_v45, %v378_v15 }
 0x11c   :  { %463 = vst.msk [vmem:[%s828_s4 + $0x68] sm:$0xff] %vm22_vm0, %v447_v14  ;;  %v409_v18 = vmul.f32 %v709_v45, %v386_v16  ;;  %v379_v19 = vld [vmem:[#allocation2 + $0x38] sm:$0xff] }
 0x11d   :  { %v387_v20 = vld [vmem:[#allocation2 + $0x78] sm:$0xff]  ;;  %v424_v21 = vadd.f32 %v714_v55, %v401_v17  ;;  %v402_v23 = vmul.f32 %v709_v45, %v379_v19 }
 0x11e   :  { %v432_v22 = vadd.f32 %v714_v55, %v409_v18  ;;  %v410_v24 = vmul.f32 %v709_v45, %v387_v20 }
 0x11f   :  { %v440_v25 = vmax.f32 %v424_v21, 0.0  ;;  %v425_v27 = vadd.f32 %v714_v55, %v402_v23 }
 0x120   :  { %v448_v26 = vmax.f32 %v432_v22, 0.0  ;;  %v433_v28 = vadd.f32 %v714_v55, %v410_v24 }
 0x121   :  { %456 = vst.msk [vmem:[%s828_s4 + $0x30] sm:$0xff] %vm22_vm0, %v440_v25  ;;  %v441_v29 = vmax.f32 %v425_v27, 0.0 }
 0x122   :  { %464 = vst.msk [vmem:[%s828_s4 + $0x70] sm:$0xff] %vm22_vm0, %v448_v26  ;;  %v449_v30 = vmax.f32 %v433_v28, 0.0 }
 0x123   :  { %457 = vst.msk [vmem:[%s828_s4 + $0x38] sm:$0xff] %vm22_vm0, %v441_v29 }
 0x124   :  { %465 = vst.msk [vmem:[%s828_s4 + $0x78] sm:$0xff] %vm22_vm0, %v449_v30 }

// kernel: complex_block_forward.4
= control target key start
LH: loop header
LB: loop body
LE: loop exit
PB: predicated region body
PF: predicated region fallthrough
CT: control target
= control target key end

     0   :  { %vm22_vm0 = vcmask 523264   ;;  %v432_v1 = vmov 0.0   ;;  %vm127_vm1 = vcmask 261120   ;;  %s634_s1 = inlined_call_operand.vmem [shape: bf16[32,64], index: 1, kind: input, shape index: {}]   ;;  %s635_s0 = inlined_call_operand.vmem [shape: bf16[128,32], index: 0, kind: input, shape index: {}]   ;;  %s636_s2 = inlined_call_operand.vmem [shape: f32[1,64], index: 2, kind: input, shape index: {}]   ;;  %s637_s3 = inlined_call_operand.vmem [shape: f32[1,64], index: 3, kind: input, shape index: {}]   ;;  %s638_s4 = inlined_call_operand.vmem [shape: f32[128,64], index: 4, kind: output, shape index: {}]  }
   0x1   :  { %v422_v0 = vld [vmem:[%s634_s1] sm:$0xff]   ;;  %25 = vst.msk [vmem:[#allocation2 + $0x10] sm:$0xff] %vm22_vm0, %v432_v1  ;;  %23 = vst.msk [vmem:[#allocation2] sm:$0xff] %vm22_vm0, %v432_v1  ;;  %v423_v2 = vld [vmem:[%s634_s1 + $0x8] sm:$0xff]  }
   0x2   :  { %24 = vst.msk [vmem:[#allocation2 + $0x8] sm:$0xff] %vm22_vm0, %v432_v1  ;;  %26 = vst.msk [vmem:[#allocation2 + $0x18] sm:$0xff] %vm22_vm0, %v432_v1  ;;  %397 = vmatprep.subr.bf16.mxu0 %v422_v0  ;;  %417 = vmatprep.subr.bf16.mxu1 %v422_v0  ;;  %v424_v3 = vld [vmem:[%s635_s0] sm:$0xff]   ;;  %v426_v5 = vld [vmem:[%s635_s0 + $0x8] sm:$0xff]  }
   0x3   :  { %27 = vst.msk [vmem:[#allocation2 + $0x20] sm:$0xff] %vm22_vm0, %v432_v1  ;;  %28 = vst.msk [vmem:[#allocation2 + $0x28] sm:$0xff] %vm22_vm0, %v432_v1  ;;  %398 = vmatpush3.bf16.msra.mxu0 %v422_v0  ;;  %419 = vmatpush3.bf16.msra.mxu1 %v422_v0  ;;  %v425_v4 = vld [vmem:[%s635_s0 + $0x20] sm:$0xff]   ;;  %v427_v6 = vld [vmem:[%s635_s0 + $0x28] sm:$0xff]  }
   0x4   :  { %29 = vst.msk [vmem:[#allocation2 + $0x30] sm:$0xff] %vm22_vm0, %v432_v1  ;;  %30 = vst.msk [vmem:[#allocation2 + $0x38] sm:$0xff] %vm22_vm0, %v432_v1  ;;  %399 = vmatprep.subr.bf16.mxu0 %v423_v2  ;;  %418 = vmatprep.subr.bf16.mxu1 %v423_v2  ;;  %v428_v7 = vld [vmem:[%s635_s0 + $0x10] sm:$0xff]   ;;  %v430_v9 = vld [vmem:[%s635_s0 + $0x18] sm:$0xff]  }
   0x5   :  { %31 = vst.msk [vmem:[#allocation2 + $0x40] sm:$0xff] %vm22_vm0, %v432_v1  ;;  %32 = vst.msk [vmem:[#allocation2 + $0x48] sm:$0xff] %vm22_vm0, %v432_v1  ;;  %401 = vmatprep.mubr.msk.bf16.mxu0 %vm127_vm1, %v424_v3  ;;  %409 = vmatprep.mubr.msk.bf16.mxu1 %vm127_vm1, %v425_v4  ;;  %v429_v8 = vld [vmem:[%s635_s0 + $0x30] sm:$0xff]   ;;  %v431_v10 = vld [vmem:[%s635_s0 + $0x38] sm:$0xff]  }
   0x6   :  { %33 = vst.msk [vmem:[#allocation2 + $0x50] sm:$0xff] %vm22_vm0, %v432_v1  ;;  %34 = vst.msk [vmem:[#allocation2 + $0x58] sm:$0xff] %vm22_vm0, %v432_v1  ;;  %v523_v39 = vld [vmem:[%s636_s2] ss:$0 sm:$0xff] }
   0x7   :  { %35 = vst.msk [vmem:[#allocation2 + $0x60] sm:$0xff] %vm22_vm0, %v432_v1  ;;  %36 = vst.msk [vmem:[#allocation2 + $0x68] sm:$0xff] %vm22_vm0, %v432_v1  ;;  %400 = vmatpush3.bf16.msra.mxu0 %v423_v2  ;;  %420 = vmatpush3.bf16.msra.mxu1 %v423_v2  ;;  %v528_v51 = vld [vmem:[%s637_s3] ss:$0 sm:$0xff] }
   0x8   :  { %37 = vst.msk [vmem:[#allocation2 + $0x70] sm:$0xff] %vm22_vm0, %v432_v1  ;;  %38 = vst.msk [vmem:[#allocation2 + $0x78] sm:$0xff] %vm22_vm0, %v432_v1  ;;  %v41_v11 = vld [vmem:[#allocation2 + $0x10] sm:$0xff]  ;;  %v39_v13 = vld [vmem:[#allocation2] sm:$0xff] }
   0x9   :  { %v42_v17 = vld [vmem:[#allocation2 + $0x18] sm:$0xff]  ;;  %v40_v23 = vld [vmem:[#allocation2 + $0x8] sm:$0xff] }
   0xa   :  { %402 = vmatmul.mubr.msk.bf16.vlgmr.msra.gmra.mrb[0].mxu0 %vm127_vm1, %v426_v5  ;;  %410 = vmatmul.mubr.msk.bf16.vlgmr.msra.gmra.mrb[0].mxu1 %vm127_vm1, %v427_v6  ;;  %v43_v37 = vld [vmem:[#allocation2 + $0x20] sm:$0xff]  ;;  %v44_v48 = vld [vmem:[#allocation2 + $0x28] sm:$0xff] }
   0xb   :  { %405 = vmatprep.mubr.msk.bf16.mxu0 %vm127_vm1, %v428_v7  ;;  %413 = vmatprep.mubr.msk.bf16.mxu1 %vm127_vm1, %v429_v8  ;;  %v45_v35 = vld [vmem:[#allocation2 + $0x30] sm:$0xff]  ;;  %v46_v42 = vld [vmem:[#allocation2 + $0x38] sm:$0xff] }
   0xc   :  { %v47_v14 = vld [vmem:[#allocation2 + $0x40] sm:$0xff]  ;;  %v48_v24 = vld [vmem:[#allocation2 + $0x48] sm:$0xff] }
   0xd   :  { %v49_v12 = vld [vmem:[#allocation2 + $0x50] sm:$0xff]  ;;  %v50_v18 = vld [vmem:[#allocation2 + $0x58] sm:$0xff] }
   0xe   :  { %v51_v38 = vld [vmem:[#allocation2 + $0x60] sm:$0xff]  ;;  %v52_v49 = vld [vmem:[#allocation2 + $0x68] sm:$0xff] }
   0xf   :  { %v53_v36 = vld [vmem:[#allocation2 + $0x70] sm:$0xff]  ;;  %v54_v43 = vld [vmem:[#allocation2 + $0x78] sm:$0xff] }
  0x12   :  { %406 = vmatmul.mubr.msk.bf16.gmra.mrb[4].mxu0 %vm127_vm1, %v430_v9  ;;  %414 = vmatmul.mubr.msk.bf16.gmra.mrb[4].mxu1 %vm127_vm1, %v431_v10 }
  0xdd   :  { %v403_v15 = vpop.f32.mrb[0].mxu0  ;;  %v411_v16 = vpop.f32.mrb[0].mxu1 }
  0xde   :  { %v251_v19 = vadd.f32 %v403_v15, %v41_v11  ;;  %v259_v20 = vadd.f32 %v411_v16, %v49_v12  ;;  %v186_v21 = vpop.f32.mrb[1].mxu0  ;;  %v218_v22 = vpop.f32.mrb[1].mxu1 }
  0xdf   :  { %v249_v25 = vadd.f32 %v186_v21, %v39_v13  ;;  %v257_v26 = vadd.f32 %v218_v22, %v47_v14  ;;  %v404_v27 = vpop.f32.mrb[2].mxu0  ;;  %v412_v28 = vpop.f32.mrb[2].mxu1 }
  0xe0   :  { %268 = vst.msk [vmem:[#allocation2 + $0x10] sm:$0xff] %vm22_vm0, %v251_v19  ;;  %276 = vst.msk [vmem:[#allocation2 + $0x50] sm:$0xff] %vm22_vm0, %v259_v20  ;;  %v252_v29 = vadd.f32 %v404_v27, %v42_v17  ;;  %v260_v30 = vadd.f32 %v412_v28, %v50_v18  ;;  %v189_v31 = vpop.f32.mrb[3].mxu0  ;;  %v221_v32 = vpop.f32.mrb[3].mxu1 }
  0xe1   :  { %266 = vst.msk [vmem:[#allocation2] sm:$0xff] %vm22_vm0, %v249_v25  ;;  %274 = vst.msk [vmem:[#allocation2 + $0x40] sm:$0xff] %vm22_vm0, %v257_v26  ;;  %v250_v33 = vadd.f32 %v189_v31, %v40_v23  ;;  %v258_v34 = vadd.f32 %v221_v32, %v48_v24 }
  0xe2   :  { %269 = vst.msk [vmem:[#allocation2 + $0x18] sm:$0xff] %vm22_vm0, %v252_v29  ;;  %277 = vst.msk [vmem:[#allocation2 + $0x58] sm:$0xff] %vm22_vm0, %v260_v30 }
  0xe3   :  { %267 = vst.msk [vmem:[#allocation2 + $0x8] sm:$0xff] %vm22_vm0, %v250_v33  ;;  %275 = vst.msk [vmem:[#allocation2 + $0x48] sm:$0xff] %vm22_vm0, %v258_v34 }
  0xe5   :  { %v407_v40 = vpop.f32.mrb[4].mxu0  ;;  %v415_v41 = vpop.f32.mrb[4].mxu1 }
  0xe6   :  { %v255_v44 = vadd.f32 %v407_v40, %v45_v35  ;;  %v263_v45 = vadd.f32 %v415_v41, %v53_v36  ;;  %v202_v46 = vpop.f32.mrb[5].mxu0  ;;  %v234_v47 = vpop.f32.mrb[5].mxu1 }
  0xe7   :  { %v287_v50 = vld [vmem:[#allocation2 + $0x10] sm:$0xff]  ;;  %v253_v53 = vadd.f32 %v202_v46, %v43_v37  ;;  %v261_v54 = vadd.f32 %v234_v47, %v51_v38  ;;  %v408_v55 = vpop.f32.mrb[6].mxu0  ;;  %v416_v56 = vpop.f32.mrb[6].mxu1 }
  0xe8   :  { %v295_v52 = vld [vmem:[#allocation2 + $0x50] sm:$0xff]  ;;  %v310_v57 = vmul.f32 %v523_v39, %v287_v50  ;;  %v285_v59 = vld [vmem:[#allocation2] sm:$0xff]  ;;  %272 = vst.msk [vmem:[#allocation2 + $0x30] sm:$0xff] %vm22_vm0, %v255_v44  ;;  %280 = vst.msk [vmem:[#allocation2 + $0x70] sm:$0xff] %vm22_vm0, %v263_v45  ;;  %v256_v61 = vadd.f32 %v408_v55, %v46_v42  ;;  %v264_v62 = vadd.f32 %v416_v56, %v54_v43  ;;  %v205_v63 = vpop.f32.mrb[7].mxu0  ;;  %v237_v0 = vpop.f32.mrb[7].mxu1 }
  0xe9   :  { %v318_v58 = vmul.f32 %v523_v39, %v295_v52  ;;  %v293_v60 = vld [vmem:[#allocation2 + $0x40] sm:$0xff]  ;;  %v308_v1 = vmul.f32 %v523_v39, %v285_v59  ;;  %v288_v3 = vld [vmem:[#allocation2 + $0x18] sm:$0xff]  ;;  %270 = vst.msk [vmem:[#allocation2 + $0x20] sm:$0xff] %vm22_vm0, %v253_v53  ;;  %278 = vst.msk [vmem:[#allocation2 + $0x60] sm:$0xff] %vm22_vm0, %v261_v54  ;;  %v254_v5 = vadd.f32 %v205_v63, %v44_v48 }
  0xea   :  { %v316_v2 = vmul.f32 %v523_v39, %v293_v60  ;;  %v296_v4 = vld [vmem:[#allocation2 + $0x58] sm:$0xff]  ;;  %v262_v6 = vadd.f32 %v237_v0, %v52_v49  ;;  %v333_v7 = vadd.f32 %v528_v51, %v310_v57  ;;  %v311_v9 = vmul.f32 %v523_v39, %v288_v3  ;;  %v286_v11 = vld [vmem:[#allocation2 + $0x8] sm:$0xff]  ;;  %273 = vst.msk [vmem:[#allocation2 + $0x38] sm:$0xff] %vm22_vm0, %v256_v61 }
  0xeb   :  { %v341_v8 = vadd.f32 %v528_v51, %v318_v58  ;;  %v319_v10 = vmul.f32 %v523_v39, %v296_v4  ;;  %v294_v12 = vld [vmem:[#allocation2 + $0x48] sm:$0xff]  ;;  %281 = vst.msk [vmem:[#allocation2 + $0x78] sm:$0xff] %vm22_vm0, %v264_v62  ;;  %v331_v13 = vadd.f32 %v528_v51, %v308_v1  ;;  %v309_v15 = vmul.f32 %v523_v39, %v286_v11 }
  0xec   :  { %v339_v14 = vadd.f32 %v528_v51, %v316_v2  ;;  %v317_v16 = vmul.f32 %v523_v39, %v294_v12  ;;  %271 = vst.msk [vmem:[#allocation2 + $0x28] sm:$0xff] %vm22_vm0, %v254_v5  ;;  %279 = vst.msk [vmem:[#allocation2 + $0x68] sm:$0xff] %vm22_vm0, %v262_v6  ;;  %v334_v17 = vadd.f32 %v528_v51, %v311_v9 }
  0xed   :  { %349 = vst.msk [vmem:[%s638_s4 + $0x10] sm:$0xff] %vm22_vm0, %v333_v7  ;;  %357 = vst.msk [vmem:[%s638_s4 + $0x50] sm:$0xff] %vm22_vm0, %v341_v8  ;;  %v342_v18 = vadd.f32 %v528_v51, %v319_v10  ;;  %v332_v19 = vadd.f32 %v528_v51, %v309_v15 }
  0xee   :  { %347 = vst.msk [vmem:[%s638_s4] sm:$0xff] %vm22_vm0, %v331_v13  ;;  %355 = vst.msk [vmem:[%s638_s4 + $0x40] sm:$0xff] %vm22_vm0, %v339_v14  ;;  %v340_v20 = vadd.f32 %v528_v51, %v317_v16 }
  0xef   :  { %350 = vst.msk [vmem:[%s638_s4 + $0x18] sm:$0xff] %vm22_vm0, %v334_v17  ;;  %358 = vst.msk [vmem:[%s638_s4 + $0x58] sm:$0xff] %vm22_vm0, %v342_v18  ;;  %v291_v21 = vld [vmem:[#allocation2 + $0x30] sm:$0xff] }
  0xf0   :  { %348 = vst.msk [vmem:[%s638_s4 + $0x8] sm:$0xff] %vm22_vm0, %v332_v19  ;;  %356 = vst.msk [vmem:[%s638_s4 + $0x48] sm:$0xff] %vm22_vm0, %v340_v20  ;;  %v299_v22 = vld [vmem:[#allocation2 + $0x70] sm:$0xff]  ;;  %v314_v23 = vmul.f32 %v523_v39, %v291_v21  ;;  %v289_v25 = vld [vmem:[#allocation2 + $0x20] sm:$0xff] }
  0xf1   :  { %v322_v24 = vmul.f32 %v523_v39, %v299_v22  ;;  %v297_v26 = vld [vmem:[#allocation2 + $0x60] sm:$0xff]  ;;  %v312_v27 = vmul.f32 %v523_v39, %v289_v25  ;;  %v292_v29 = vld [vmem:[#allocation2 + $0x38] sm:$0xff] }
  0xf2   :  { %v320_v28 = vmul.f32 %v523_v39, %v297_v26  ;;  %v300_v30 = vld [vmem:[#allocation2 + $0x78] sm:$0xff]  ;;  %v337_v31 = vadd.f32 %v528_v51, %v314_v23  ;;  %v315_v33 = vmul.f32 %v523_v39, %v292_v29 }
  0xf3   :  { %v345_v32 = vadd.f32 %v528_v51, %v322_v24  ;;  %v323_v34 = vmul.f32 %v523_v39, %v300_v30  ;;  %v290_v35 = vld [vmem:[#allocation2 + $0x28] sm:$0xff]  ;;  %v335_v37 = vadd.f32 %v528_v51, %v312_v27 }
  0xf4   :  { %v298_v36 = vld [vmem:[#allocation2 + $0x68] sm:$0xff]  ;;  %v343_v38 = vadd.f32 %v528_v51, %v320_v28  ;;  %v313_v40 = vmul.f32 %v523_v39, %v290_v35  ;;  %353 = vst.msk [vmem:[%s638_s4 + $0x30] sm:$0xff] %vm22_vm0, %v337_v31  ;;  %v338_v42 = vadd.f32 %v528_v51, %v315_v33 }
  0xf5   :  { %v321_v41 = vmul.f32 %v523_v39, %v298_v36  ;;  %361 = vst.msk [vmem:[%s638_s4 + $0x70] sm:$0xff] %vm22_vm0, %v345_v32  ;;  %v346_v43 = vadd.f32 %v528_v51, %v323_v34  ;;  %351 = vst.msk [vmem:[%s638_s4 + $0x20] sm:$0xff] %vm22_vm0, %v335_v37 }
  0xf6   :  { %359 = vst.msk [vmem:[%s638_s4 + $0x60] sm:$0xff] %vm22_vm0, %v343_v38  ;;  %v336_v39 = vadd.f32 %v528_v51, %v313_v40  ;;  %354 = vst.msk [vmem:[%s638_s4 + $0x38] sm:$0xff] %vm22_vm0, %v338_v42 }
  0xf7   :  { %v344_v44 = vadd.f32 %v528_v51, %v321_v41  ;;  %362 = vst.msk [vmem:[%s638_s4 + $0x78] sm:$0xff] %vm22_vm0, %v346_v43 }
  0xf8   :  { %352 = vst.msk [vmem:[%s638_s4 + $0x28] sm:$0xff] %vm22_vm0, %v336_v39 }
  0xf9   :  { %360 = vst.msk [vmem:[%s638_s4 + $0x68] sm:$0xff] %vm22_vm0, %v344_v44 }

// kernel: complex_block_forward.7
= control target key start
LH: loop header
LB: loop body
LE: loop exit
PB: predicated region body
PF: predicated region fallthrough
CT: control target
= control target key end

     0   :  { %vm123_vm0 = vcmask 130048   ;;  %vm26_vm1 = vcmask 523264   ;;  %v508_v4 = vmov 0.0   ;;  %s727_s0 = inlined_call_operand.vmem [shape: bf16[128,16], index: 0, kind: input, shape index: {}]   ;;  %s728_s1 = inlined_call_operand.vmem [shape: bf16[16,64], index: 1, kind: input, shape index: {}]   ;;  %s729_s2 = inlined_call_operand.vmem [shape: f32[1,64], index: 2, kind: input, shape index: {}]   ;;  %s730_s3 = inlined_call_operand.vmem [shape: f32[1,64], index: 3, kind: input, shape index: {}]   ;;  %s731_s4 = inlined_call_operand.vmem [shape: f32[128,64], index: 4, kind: input, shape index: {}]   ;;  %s732_s5 = inlined_call_operand.hbm [shape: f32[128,64], index: 5, kind: output, shape index: {}]  }
   0x1   :  { %v475_v0 = vld [vmem:[%s728_s1] sm:$0xff]   ;;  %v478_v3 = vld [vmem:[%s727_s0 + $0x8] sm:$0xff]   ;;  %29 = vst.msk [vmem:[#allocation2 + $0x10] sm:$0xff] %vm26_vm1, %v508_v4  ;;  %27 = vst.msk [vmem:[#allocation2] sm:$0xff] %vm26_vm1, %v508_v4 }
   0x2   :  { %v476_v1 = vld [vmem:[%s727_s0] sm:$0xff]   ;;  %451 = vmatprep.subr.bf16.mxu0 %v475_v0  ;;  %469 = vmatprep.subr.bf16.mxu1 %v475_v0  ;;  %28 = vst.msk [vmem:[#allocation2 + $0x8] sm:$0xff] %vm26_vm1, %v508_v4  ;;  %30 = vst.msk [vmem:[#allocation2 + $0x18] sm:$0xff] %vm26_vm1, %v508_v4  ;;  %v479_v5 = vld [vmem:[%s727_s0 + $0x28] sm:$0xff]  }
   0x3   :  { %v477_v2 = vld [vmem:[%s727_s0 + $0x20] sm:$0xff]   ;;  %452 = vmatpush3.bf16.msra.mxu0 %v475_v0  ;;  %470 = vmatpush3.bf16.msra.mxu1 %v475_v0  ;;  %31 = vst.msk [vmem:[#allocation2 + $0x20] sm:$0xff] %vm26_vm1, %v508_v4  ;;  %32 = vst.msk [vmem:[#allocation2 + $0x28] sm:$0xff] %vm26_vm1, %v508_v4  ;;  %v480_v6 = vld [vmem:[%s727_s0 + $0x10] sm:$0xff]  }
   0x4   :  { %33 = vst.msk [vmem:[#allocation2 + $0x30] sm:$0xff] %vm26_vm1, %v508_v4  ;;  %34 = vst.msk [vmem:[#allocation2 + $0x38] sm:$0xff] %vm26_vm1, %v508_v4  ;;  %453 = vmatprep.mubr.msk.bf16.mxu0 %vm123_vm0, %v476_v1  ;;  %461 = vmatprep.mubr.msk.bf16.mxu1 %vm123_vm0, %v477_v2  ;;  %v481_v7 = vld [vmem:[%s727_s0 + $0x30] sm:$0xff]  }
   0x5   :  { %35 = vst.msk [vmem:[#allocation2 + $0x40] sm:$0xff] %vm26_vm1, %v508_v4  ;;  %36 = vst.msk [vmem:[#allocation2 + $0x48] sm:$0xff] %vm26_vm1, %v508_v4 }
   0x6   :  { %37 = vst.msk [vmem:[#allocation2 + $0x50] sm:$0xff] %vm26_vm1, %v508_v4  ;;  %38 = vst.msk [vmem:[#allocation2 + $0x58] sm:$0xff] %vm26_vm1, %v508_v4  ;;  %454 = vmatmul.mubr.msk.bf16.vlgmr.msra.gmra.mrb[0].mxu0 %vm123_vm0, %v478_v3  ;;  %462 = vmatmul.mubr.msk.bf16.vlgmr.msra.gmra.mrb[0].mxu1 %vm123_vm0, %v479_v5 }
   0x7   :  { %39 = vst.msk [vmem:[#allocation2 + $0x60] sm:$0xff] %vm26_vm1, %v508_v4  ;;  %40 = vst.msk [vmem:[#allocation2 + $0x68] sm:$0xff] %vm26_vm1, %v508_v4  ;;  %457 = vmatprep.mubr.msk.bf16.mxu0 %vm123_vm0, %v480_v6  ;;  %465 = vmatprep.mubr.msk.bf16.mxu1 %vm123_vm0, %v481_v7 }
   0x8   :  { %41 = vst.msk [vmem:[#allocation2 + $0x70] sm:$0xff] %vm26_vm1, %v508_v4  ;;  %42 = vst.msk [vmem:[#allocation2 + $0x78] sm:$0xff] %vm26_vm1, %v508_v4 }
   0x9   :  { %10 = vsyncpa [#allocation4], 0  ;;  %v482_v8 = vld [vmem:[%s727_s0 + $0x18] sm:$0xff]   ;;  %v45_v10 = vld [vmem:[#allocation2 + $0x10] sm:$0xff] }
   0xa   :  { %v483_v9 = vld [vmem:[%s727_s0 + $0x38] sm:$0xff]   ;;  %v43_v12 = vld [vmem:[#allocation2] sm:$0xff]  ;;  %v44_v22 = vld [vmem:[#allocation2 + $0x8] sm:$0xff] }
   0xb   :  { %v46_v16 = vld [vmem:[#allocation2 + $0x18] sm:$0xff]  ;;  %v49_v34 = vld [vmem:[#allocation2 + $0x30] sm:$0xff]  ;;  %v47_v36 = vld [vmem:[#allocation2 + $0x20] sm:$0xff] }
   0xc   :  { %v51_v13 = vld [vmem:[#allocation2 + $0x40] sm:$0xff]  ;;  %v52_v23 = vld [vmem:[#allocation2 + $0x48] sm:$0xff]  ;;  %v50_v41 = vld [vmem:[#allocation2 + $0x38] sm:$0xff] }
   0xd   :  { %v53_v11 = vld [vmem:[#allocation2 + $0x50] sm:$0xff]  ;;  %v54_v17 = vld [vmem:[#allocation2 + $0x58] sm:$0xff]  ;;  %v604_v38 = vld [vmem:[%s729_s2] ss:$0 sm:$0xff] }
   0xe   :  { %458 = vmatmul.mubr.msk.bf16.gmra.mrb[4].mxu0 %vm123_vm0, %v482_v8  ;;  %466 = vmatmul.mubr.msk.bf16.gmra.mrb[4].mxu1 %vm123_vm0, %v483_v9  ;;  %v55_v37 = vld [vmem:[#allocation2 + $0x60] sm:$0xff]  ;;  %v48_v48 = vld [vmem:[#allocation2 + $0x28] sm:$0xff]  ;;  %v345_v51 = vld [vmem:[%s731_s4 + $0x10] sm:$0xff] }
   0xf   :  { %v57_v35 = vld [vmem:[#allocation2 + $0x70] sm:$0xff]  ;;  %v58_v42 = vld [vmem:[#allocation2 + $0x78] sm:$0xff]  ;;  %v609_v43 = vld [vmem:[%s730_s3] ss:$0 sm:$0xff]  ;;  %s509_s3 = smov [#allocation3]  }
  0x10   :  { %v56_v49 = vld [vmem:[#allocation2 + $0x68] sm:$0xff]  ;;  %v353_v59 = vld [vmem:[%s731_s4 + $0x50] sm:$0xff]  ;;  %v343_v3 = vld [vmem:[%s731_s4] sm:$0xff]  ;;  %s412_s15 = sshll.u32 %s509_s3, 4  ;;  %s413_s15 = int_to_ptr.vmem [resolvable:$true] %s412_s15 }
  0x11   :  { %p489_p1 = scmp.lt.s32.totalorder %s413_s15, %s413_s15 }
  0xd9   :  { %v455_v14 = vpop.f32.mrb[0].mxu0  ;;  %v463_v15 = vpop.f32.mrb[0].mxu1 }
  0xda   :  { %v247_v18 = vadd.f32 %v455_v14, %v45_v10  ;;  %v255_v19 = vadd.f32 %v463_v15, %v53_v11  ;;  %v182_v20 = vpop.f32.mrb[1].mxu0  ;;  %v214_v21 = vpop.f32.mrb[1].mxu1  ;;  %v351_v11 = vld [vmem:[%s731_s4 + $0x40] sm:$0xff] }
  0xdb   :  { %v245_v24 = vadd.f32 %v182_v20, %v43_v12  ;;  %v253_v25 = vadd.f32 %v214_v21, %v51_v13  ;;  %v456_v26 = vpop.f32.mrb[2].mxu0  ;;  %v464_v27 = vpop.f32.mrb[2].mxu1 }
  0xdc   :  { %264 = vst.msk [vmem:[#allocation2 + $0x10] sm:$0xff] %vm26_vm1, %v247_v18  ;;  %272 = vst.msk [vmem:[#allocation2 + $0x50] sm:$0xff] %vm26_vm1, %v255_v19  ;;  %v248_v28 = vadd.f32 %v456_v26, %v46_v16  ;;  %v256_v29 = vadd.f32 %v464_v27, %v54_v17  ;;  %v185_v30 = vpop.f32.mrb[3].mxu0  ;;  %v217_v31 = vpop.f32.mrb[3].mxu1  ;;  %v346_v18 = vld [vmem:[%s731_s4 + $0x18] sm:$0xff]  ;;  %v344_v26 = vld [vmem:[%s731_s4 + $0x8] sm:$0xff] }
  0xdd   :  { %262 = vst.msk [vmem:[#allocation2] sm:$0xff] %vm26_vm1, %v245_v24  ;;  %270 = vst.msk [vmem:[#allocation2 + $0x40] sm:$0xff] %vm26_vm1, %v253_v25  ;;  %v246_v32 = vadd.f32 %v185_v30, %v44_v22  ;;  %v254_v33 = vadd.f32 %v217_v31, %v52_v23  ;;  %v354_v19 = vld [vmem:[%s731_s4 + $0x58] sm:$0xff]  ;;  %v352_v27 = vld [vmem:[%s731_s4 + $0x48] sm:$0xff] }
  0xde   :  { %265 = vst.msk [vmem:[#allocation2 + $0x18] sm:$0xff] %vm26_vm1, %v248_v28  ;;  %273 = vst.msk [vmem:[#allocation2 + $0x58] sm:$0xff] %vm26_vm1, %v256_v29 }
  0xdf   :  { %263 = vst.msk [vmem:[#allocation2 + $0x8] sm:$0xff] %vm26_vm1, %v246_v32  ;;  %271 = vst.msk [vmem:[#allocation2 + $0x48] sm:$0xff] %vm26_vm1, %v254_v33 }
  0xe1   :  { %v459_v39 = vpop.f32.mrb[4].mxu0  ;;  %v467_v40 = vpop.f32.mrb[4].mxu1 }
  0xe2   :  { %v251_v44 = vadd.f32 %v459_v39, %v49_v34  ;;  %v259_v45 = vadd.f32 %v467_v40, %v57_v35  ;;  %v198_v46 = vpop.f32.mrb[5].mxu0  ;;  %v230_v47 = vpop.f32.mrb[5].mxu1 }
  0xe3   :  { %v283_v50 = vld [vmem:[#allocation2 + $0x10] sm:$0xff]  ;;  %v249_v53 = vadd.f32 %v198_v46, %v47_v36  ;;  %v257_v54 = vadd.f32 %v230_v47, %v55_v37  ;;  %v460_v55 = vpop.f32.mrb[6].mxu0  ;;  %v468_v56 = vpop.f32.mrb[6].mxu1 }
  0xe4   :  { %v291_v52 = vld [vmem:[#allocation2 + $0x50] sm:$0xff]  ;;  %v306_v57 = vmul.f32 %v604_v38, %v283_v50  ;;  %v281_v60 = vld [vmem:[#allocation2] sm:$0xff]  ;;  %268 = vst.msk [vmem:[#allocation2 + $0x30] sm:$0xff] %vm26_vm1, %v251_v44  ;;  %276 = vst.msk [vmem:[#allocation2 + $0x70] sm:$0xff] %vm26_vm1, %v259_v45  ;;  %v252_v62 = vadd.f32 %v460_v55, %v50_v41  ;;  %v260_v63 = vadd.f32 %v468_v56, %v58_v42  ;;  %v201_v0 = vpop.f32.mrb[7].mxu0  ;;  %v233_v1 = vpop.f32.mrb[7].mxu1 }
  0xe5   :  { %v314_v58 = vmul.f32 %v604_v38, %v291_v52  ;;  %v289_v61 = vld [vmem:[#allocation2 + $0x40] sm:$0xff]  ;;  %v304_v2 = vmul.f32 %v604_v38, %v281_v60  ;;  %v284_v5 = vld [vmem:[#allocation2 + $0x18] sm:$0xff]  ;;  %266 = vst.msk [vmem:[#allocation2 + $0x20] sm:$0xff] %vm26_vm1, %v249_v53  ;;  %274 = vst.msk [vmem:[#allocation2 + $0x60] sm:$0xff] %vm26_vm1, %v257_v54  ;;  %v250_v7 = vadd.f32 %v201_v0, %v48_v48 }
  0xe6   :  { %v312_v4 = vmul.f32 %v604_v38, %v289_v61  ;;  %v292_v6 = vld [vmem:[#allocation2 + $0x58] sm:$0xff]  ;;  %v258_v8 = vadd.f32 %v233_v1, %v56_v49  ;;  %v329_v9 = vadd.f32 %v609_v43, %v306_v57  ;;  %v307_v12 = vmul.f32 %v604_v38, %v284_v5  ;;  %v282_v14 = vld [vmem:[#allocation2 + $0x8] sm:$0xff]  ;;  %269 = vst.msk [vmem:[#allocation2 + $0x38] sm:$0xff] %vm26_vm1, %v252_v62  ;;  %v349_v42 = vld [vmem:[%s731_s4 + $0x30] sm:$0xff] }
  0xe7   :  { %v337_v10 = vadd.f32 %v609_v43, %v314_v58  ;;  %v315_v13 = vmul.f32 %v604_v38, %v292_v6  ;;  %v290_v15 = vld [vmem:[#allocation2 + $0x48] sm:$0xff]  ;;  %277 = vst.msk [vmem:[#allocation2 + $0x78] sm:$0xff] %vm26_vm1, %v260_v63  ;;  %v327_v16 = vadd.f32 %v609_v43, %v304_v2  ;;  %v305_v20 = vmul.f32 %v604_v38, %v282_v14  ;;  %v357_v49 = vld [vmem:[%s731_s4 + $0x70] sm:$0xff]  ;;  %v347_v55 = vld [vmem:[%s731_s4 + $0x20] sm:$0xff] }
  0xe8   :  { %v335_v17 = vadd.f32 %v609_v43, %v312_v4  ;;  %v313_v21 = vmul.f32 %v604_v38, %v290_v15  ;;  %267 = vst.msk [vmem:[#allocation2 + $0x28] sm:$0xff] %vm26_vm1, %v250_v7  ;;  %275 = vst.msk [vmem:[#allocation2 + $0x68] sm:$0xff] %vm26_vm1, %v258_v8  ;;  %v361_v22 = vadd.f32 %v345_v51, %v329_v9  ;;  %v355_v61 = vld [vmem:[%s731_s4 + $0x60] sm:$0xff]  ;;  %v350_v4 = vld [vmem:[%s731_s4 + $0x38] sm:$0xff] }
  0xe9   :  { %v369_v23 = vadd.f32 %v353_v59, %v337_v10  ;;  %v330_v24 = vadd.f32 %v609_v43, %v307_v12  ;;  %v338_v25 = vadd.f32 %v609_v43, %v315_v13  ;;  %v359_v28 = vadd.f32 %v343_v3, %v327_v16  ;;  %v358_v5 = vld [vmem:[%s731_s4 + $0x78] sm:$0xff]  ;;  %v348_v12 = vld [vmem:[%s731_s4 + $0x28] sm:$0xff] }
  0xea   :  { %v367_v29 = vadd.f32 %v351_v11, %v335_v17  ;;  %v328_v30 = vadd.f32 %v609_v43, %v305_v20  ;;  %v336_v31 = vadd.f32 %v609_v43, %v313_v21  ;;  %v377_v32 = vmax.f32 %v361_v22, 0.0  ;;  %v356_v13 = vld [vmem:[%s731_s4 + $0x68] sm:$0xff]  ;;  %s484_s4 = scalar_lea.vmem %s413_s15, 2048 }
  0xeb   :  { %v385_v33 = vmax.f32 %v369_v23, 0.0  ;;  %v362_v34 = vadd.f32 %v346_v18, %v330_v24  ;;  %v370_v35 = vadd.f32 %v354_v19, %v338_v25  ;;  %v375_v36 = vmax.f32 %v359_v28, 0.0  ;;  %v287_v41 = vld [vmem:[#allocation2 + $0x30] sm:$0xff]  ;;  %p485_p0 = scmp.ne.s32.totalorder %s413_s15, %s484_s4  ;;  %p490_p2 = scmp.lt.s32.totalorder %s484_s4, %s484_s4 }
  0xec   :  { %v383_v37 = vmax.f32 %v367_v29, 0.0  ;;  %v360_v39 = vadd.f32 %v344_v26, %v328_v30  ;;  %v368_v40 = vadd.f32 %v352_v27, %v336_v31  ;;  %v295_v44 = vld [vmem:[#allocation2 + $0x70] sm:$0xff]  ;;  %393 = vst.msk [vmem:[#allocation3 + $0x10] sm:$0xff] %vm26_vm1, %v377_v32  ;;  %v310_v47 = vmul.f32 %v604_v38, %v287_v41  ;;  %v285_v50 = vld [vmem:[#allocation2 + $0x20] sm:$0xff] }
  0xed   :  { %401 = vst.msk [vmem:[#allocation3 + $0x50] sm:$0xff] %vm26_vm1, %v385_v33  ;;  %v378_v45 = vmax.f32 %v362_v34, 0.0  ;;  %v386_v46 = vmax.f32 %v370_v35, 0.0  ;;  %v318_v48 = vmul.f32 %v604_v38, %v295_v44  ;;  %v293_v51 = vld [vmem:[#allocation2 + $0x60] sm:$0xff]  ;;  %391 = vst.msk [vmem:[#allocation3] sm:$0xff] %vm26_vm1, %v375_v36  ;;  %v308_v54 = vmul.f32 %v604_v38, %v285_v50  ;;  %v288_v57 = vld [vmem:[#allocation2 + $0x38] sm:$0xff]  ;;  %p491_p3 = por %p490_p2, %p489_p1 }
  0xee   :  { %399 = vst.msk [vmem:[#allocation3 + $0x40] sm:$0xff] %vm26_vm1, %v383_v37  ;;  %v376_v52 = vmax.f32 %v360_v39, 0.0  ;;  %v384_v53 = vmax.f32 %v368_v40, 0.0  ;;  %v316_v56 = vmul.f32 %v604_v38, %v293_v51  ;;  %v296_v58 = vld [vmem:[#allocation2 + $0x78] sm:$0xff]  ;;  %v333_v59 = vadd.f32 %v609_v43, %v310_v47 }
  0xef   :  { %394 = vst.msk [vmem:[#allocation3 + $0x18] sm:$0xff] %vm26_vm1, %v378_v45  ;;  %402 = vst.msk [vmem:[#allocation3 + $0x58] sm:$0xff] %vm26_vm1, %v386_v46  ;;  %v341_v60 = vadd.f32 %v609_v43, %v318_v48  ;;  %v311_v62 = vmul.f32 %v604_v38, %v288_v57  ;;  %v319_v63 = vmul.f32 %v604_v38, %v296_v58  ;;  %v286_v0 = vld [vmem:[#allocation2 + $0x28] sm:$0xff]  ;;  %p492_p4 = pnand %p491_p3, %p485_p0 }
  0xf0   :  { %v294_v1 = vld [vmem:[#allocation2 + $0x68] sm:$0xff]  ;;  %392 = vst.msk [vmem:[#allocation3 + $0x8] sm:$0xff] %vm26_vm1, %v376_v52  ;;  %400 = vst.msk [vmem:[#allocation3 + $0x48] sm:$0xff] %vm26_vm1, %v384_v53  ;;  %v331_v2 = vadd.f32 %v609_v43, %v308_v54  ;;  %v339_v3 = vadd.f32 %v609_v43, %v316_v56  ;;  %v309_v6 = vmul.f32 %v604_v38, %v286_v0 }
  0xf1   :  { %v317_v7 = vmul.f32 %v604_v38, %v294_v1  ;;  %v365_v8 = vadd.f32 %v349_v42, %v333_v59  ;;  %v373_v9 = vadd.f32 %v357_v49, %v341_v60  ;;  %v334_v10 = vadd.f32 %v609_v43, %v311_v62 }
  0xf2   :  { %v342_v11 = vadd.f32 %v609_v43, %v319_v63  ;;  %v363_v14 = vadd.f32 %v347_v55, %v331_v2  ;;  %v371_v15 = vadd.f32 %v355_v61, %v339_v3  ;;  %v332_v16 = vadd.f32 %v609_v43, %v309_v6 }
  0xf3   :  { %v340_v38 = vadd.f32 %v609_v43, %v317_v7  ;;  %v381_v17 = vmax.f32 %v365_v8, 0.0  ;;  %v389_v18 = vmax.f32 %v373_v9, 0.0  ;;  %v366_v19 = vadd.f32 %v350_v4, %v334_v10 }
  0xf4   :  { %v374_v20 = vadd.f32 %v358_v5, %v342_v11  ;;  %v379_v21 = vmax.f32 %v363_v14, 0.0  ;;  %v387_v22 = vmax.f32 %v371_v15, 0.0  ;;  %v364_v23 = vadd.f32 %v348_v12, %v332_v16 }
  0xf5   :  { %v372_v24 = vadd.f32 %v356_v13, %v340_v38  ;;  %397 = vst.msk [vmem:[#allocation3 + $0x30] sm:$0xff] %vm26_vm1, %v381_v17  ;;  %405 = vst.msk [vmem:[#allocation3 + $0x70] sm:$0xff] %vm26_vm1, %v389_v18  ;;  %v382_v25 = vmax.f32 %v366_v19, 0.0 }
  0xf6   :  { %v390_v26 = vmax.f32 %v374_v20, 0.0  ;;  %395 = vst.msk [vmem:[#allocation3 + $0x20] sm:$0xff] %vm26_vm1, %v379_v21  ;;  %403 = vst.msk [vmem:[#allocation3 + $0x60] sm:$0xff] %vm26_vm1, %v387_v22  ;;  %v380_v43 = vmax.f32 %v364_v23, 0.0 }
  0xf7   :  { %v388_v27 = vmax.f32 %v372_v24, 0.0  ;;  %398 = vst.msk [vmem:[#allocation3 + $0x38] sm:$0xff] %vm26_vm1, %v382_v25 }
  0xf8   :  { %406 = vst.msk [vmem:[#allocation3 + $0x78] sm:$0xff] %vm26_vm1, %v390_v26  ;;  %396 = vst.msk [vmem:[#allocation3 + $0x28] sm:$0xff] %vm26_vm1, %v380_v43 }
  0xf9   :  { %404 = vst.msk [vmem:[#allocation3 + $0x68] sm:$0xff] %vm26_vm1, %v388_v27 }
  0xfa   :  { %495 = shalt.err (!%p492_p4)
}
  0xfb   :  { %s496_s18 = scalar_lea.hbm %s732_s5, 2048 }
  0xfc   :  { %p497_p5 = scmp.ne.s32.totalorder %s732_s5, %s496_s18  ;;  %p500_p6 = scmp.lt.u32.totalorder %s496_s18, %s732_s5 }
  0xfe   :  { %p502_p7 = pnand %p500_p6, %p497_p5 }
 0x100   :  { %505 = shalt.err (!%p502_p7)
}
 0x101   :  { %s510_s23 = smov 128   ;;  %s511_s24 = smov 8  }
 0x102   :  { %418 = dma.vmem_to_hbm [thread:$0]  %s413_s15, 2048, %s732_s5, [#allocation4], %s510_s23, %s510_s23, %s511_s24  }
 0x103   :  { %506 = dma.done.wait [#allocation4], 2048  }
 0x104   :  { %507 = vsyncadd [#allocation4], 4294965248 }
 0x105   :  { %422 = vsyncpa [#allocation4], 1 }

</bundles_post_ra>
